<compile_context>
chip_gen: v5e
topology: v5e:2x2
jax: 0.10.0
libtpu: 0.0.40
codegen_flags: <defaults>
</compile_context>

<pallas_src>
from functools import partial

import jax
import jax.numpy as jnp
import numpy as np
from jax.experimental import pallas as pl
from jax.experimental.pallas import tpu as pltpu


# ----------------------------------------------------------------------------
# Fused stacked-LSTM kernel (both directions batch-fused, all layers fused).
#   x_ref    : (T*2B, E)   bf16   rows ordered [time, fused-direction batch]
#   per layer: w_ih (D_in, 4H) bf16, w_hh (H, 4H) bf16, b (1, 4H) f32
#   out_ref  : (T*2B, H)   f32    last layer's h; also the inter-layer buffer
#   xproj_sc : (T*2B, 4H)  f32    hoisted input-projection scratch
# PyTorch gate order: i, f, g, o.  Zero initial state.
# ----------------------------------------------------------------------------
def _lstm_stack_kernel(*refs, num_layers, hidden, seq_len, two_b):
    x_ref = refs[0]
    layer_refs = refs[1:1 + 3 * num_layers]
    out_ref = refs[1 + 3 * num_layers]
    xproj_sc = refs[2 + 3 * num_layers]
    H = hidden

    for l in range(num_layers):
        wih_ref, whh_ref, b_ref = layer_refs[3 * l:3 * l + 3]

        # Input projection for ALL timesteps in one MXU matmul (M = T*2B),
        # bias folded in and hoisted out of the time loop.
        src = x_ref[...] if l == 0 else out_ref[...].astype(jnp.bfloat16)
        xproj_sc[...] = (
            jnp.dot(src, wih_ref[...], preferred_element_type=jnp.float32)
            + b_ref[...])

        whh = whh_ref[...]  # (H, 4H) bf16, loop-invariant (lives in vregs)

        def step(t, carry):
            h, c = carry
            start = t * two_b
            gates = xproj_sc[pl.ds(start, two_b), :] + jnp.dot(
                h.astype(jnp.bfloat16), whh,
                preferred_element_type=jnp.float32)           # (2B, 4H) f32
            i = jax.nn.sigmoid(gates[:, 0 * H:1 * H])
            f = jax.nn.sigmoid(gates[:, 1 * H:2 * H])
            g = jnp.tanh(gates[:, 2 * H:3 * H])
            o = jax.nn.sigmoid(gates[:, 3 * H:4 * H])
            c = f * c + i * g
            h = o * jnp.tanh(c)
            out_ref[pl.ds(start, two_b), :] = h
            return (h, c)

        init = (jnp.zeros((two_b, H), jnp.float32),
                jnp.zeros((two_b, H), jnp.float32))
        jax.lax.fori_loop(0, seq_len, step, init, unroll=seq_len <= 32)


def lstm_stack(x_flat, lstm_params, *, seq_len, two_b):
    """x_flat: (T*2B, E) bf16 -> (T*2B, H) f32 (last layer hidden states)."""
    num_layers = len(lstm_params)
    H = lstm_params[0][1].shape[0]
    rows = x_flat.shape[0]
    inputs = [x_flat]
    for (wih, whh, b) in lstm_params:
        inputs += [wih.astype(jnp.bfloat16), whh.astype(jnp.bfloat16), b]
    return pl.pallas_call(
        partial(_lstm_stack_kernel, num_layers=num_layers, hidden=H,
                seq_len=seq_len, two_b=two_b),
        out_shape=jax.ShapeDtypeStruct((rows, H), jnp.float32),
        scratch_shapes=[pltpu.VMEM((rows, 4 * H), jnp.float32)],
    )(*inputs)


# ----------------------------------------------------------------------------
# Head kernel: one flattened decoder matmul over both (shifted) directions,
# fwd/rvs add, bias slab, fused stable log_softmax.
#   h_ref     : (2*L*B, H) bf16   rows [0, L*B) = shifted fwd h (row 0 of each
#                                 time-0 block is zero), rows [L*B, 2*L*B) =
#                                 shifted rvs h (last time block zero)
#   w_ref     : (H, E)     bf16
#   bslab_ref : (L*B, E)   f32    coef(t) * dec_b  (coef = 1 at boundaries, 2 inside)
#   out_ref   : (L*B, E)   f32    log-probs, row = t*B + b
# ----------------------------------------------------------------------------
def _head_kernel(h_ref, w_ref, bslab_ref, out_ref):
    half = out_ref.shape[0]
    z = jnp.dot(h_ref[...], w_ref[...], preferred_element_type=jnp.float32)
    s = z[:half, :] + z[half:, :] + bslab_ref[...]
    m = jnp.max(s, axis=-1, keepdims=True)
    e = jnp.exp(s - m)
    lse = jnp.log(jnp.sum(e, axis=-1, keepdims=True)) + m
    out_ref[...] = (s - lse).astype(out_ref.dtype)


def decode_head(hcat_flat, w_bf16, bias_slab):
    rows, E = bias_slab.shape
    return pl.pallas_call(
        _head_kernel,
        out_shape=jax.ShapeDtypeStruct((rows, E), jnp.float32),
    )(hcat_flat, w_bf16, bias_slab)


# ----------------------------------------------------------------------------
# Full forward (mirrors P_ELMo_lm.forward). `lengths` unused, as in PyTorch.
# ----------------------------------------------------------------------------
def p_elmo_lm_forward(params, x_tokens, lengths=None):
    B, L = x_tokens.shape
    T = L - 1
    H = params["lstm"][0][1].shape[0]
    E = params["dec_w"].shape[1]

    emb = jnp.take(params["embed"], x_tokens, axis=0)           # (B, L, E)
    emb_tm = jnp.transpose(emb, (1, 0, 2))                      # (L, B, E)
    x_fwd = emb_tm[:-1]                                         # (T, B, E)
    x_rvs = emb_tm[1:][::-1]                                    # (T, B, E)
    x_cat = jnp.concatenate([x_fwd, x_rvs], axis=1)             # (T, 2B, E)
    x_flat = x_cat.reshape(T * 2 * B, E).astype(jnp.bfloat16)   # (T*2B, E)

    h_flat = lstm_stack(x_flat, params["lstm"], seq_len=T, two_b=2 * B)

    h3 = h_flat.reshape(T, 2 * B, H)
    hf = h3[:, :B]                                              # fwd, fwd-time
    hr = h3[:, B:][::-1]                                        # rvs, back to fwd-time
    zero = jnp.zeros((1, B, H), h_flat.dtype)
    hf_sh = jnp.concatenate([zero, hf], axis=0).reshape(L * B, H)   # (L*B, H)
    hr_sh = jnp.concatenate([hr, zero], axis=0).reshape(L * B, H)   # (L*B, H)
    hcat = jnp.concatenate([hf_sh, hr_sh], axis=0).astype(jnp.bfloat16)

    # bias slab: interior rows get dec_b from both directions, boundaries once
    coef = jnp.full((L,), 2.0, jnp.float32).at[0].set(1.0).at[L - 1].set(1.0)
    bslab = coef[:, None, None] * params["dec_b"].reshape(1, 1, E)
    bslab = jnp.broadcast_to(bslab, (L, B, E)).reshape(L * B, E)

    logits_flat = decode_head(hcat, params["dec_w"].astype(jnp.bfloat16), bslab)
    return logits_flat.reshape(L, B, E).transpose(1, 0, 2)       # (B, L, E)


# ----------------------------------------------------------------------------
# Pure-JAX reference (same bf16-operand / f32-accumulation math) for validation.
# ----------------------------------------------------------------------------
def _lstm_layer_ref(x_tm, wih_bf, whh_bf, b):
    T, Bn, D = x_tm.shape
    H = whh_bf.shape[0]
    xb = x_tm.astype(jnp.bfloat16)
    xproj = (jnp.dot(xb.reshape(T * Bn, D), wih_bf,
                     preferred_element_type=jnp.float32)
             .reshape(T, Bn, 4 * H) + b)

    def step(carry, xp_t):
        h, c = carry
        g = xp_t + jnp.dot(h.astype(jnp.bfloat16), whh_bf,
                           preferred_element_type=jnp.float32)
        i = jax.nn.sigmoid(g[:, :H])
        f = jax.nn.sigmoid(g[:, H:2 * H])
        gg = jnp.tanh(g[:, 2 * H:3 * H])
        o = jax.nn.sigmoid(g[:, 3 * H:])
        c = f * c + i * gg
        h = o * jnp.tanh(c)
        return (h, c), h

    init = (jnp.zeros((Bn, H), jnp.float32), jnp.zeros((Bn, H), jnp.float32))
    _, hs = jax.lax.scan(step, init, xproj)
    return hs


def reference_forward(params, x_tokens):
    B, L = x_tokens.shape
    T = L - 1
    H = params["lstm"][0][1].shape[0]
    E = params["dec_w"].shape[1]
    emb = jnp.take(params["embed"], x_tokens, axis=0)
    emb_tm = jnp.transpose(emb, (1, 0, 2))
    h_fwd = emb_tm[:-1]
    h_rvs = emb_tm[1:][::-1]
    for (wih, whh, b) in params["lstm"]:
        wih_bf = wih.astype(jnp.bfloat16)
        whh_bf = whh.astype(jnp.bfloat16)
        h_fwd = _lstm_layer_ref(h_fwd, wih_bf, whh_bf, b)
        h_rvs = _lstm_layer_ref(h_rvs, wih_bf, whh_bf, b)
    h_rvs = h_rvs[::-1]
    w_bf = params["dec_w"].astype(jnp.bfloat16)
    zf = (jnp.dot(h_fwd.reshape(T * B, H).astype(jnp.bfloat16), w_bf,
                  preferred_element_type=jnp.float32).reshape(T, B, E)
          + params["dec_b"])
    zr = (jnp.dot(h_rvs.reshape(T * B, H).astype(jnp.bfloat16), w_bf,
                  preferred_element_type=jnp.float32).reshape(T, B, E)
          + params["dec_b"])
    zero = jnp.zeros((1, B, E), jnp.float32)
    zf = jnp.concatenate([zero, zf], axis=0)
    zr = jnp.concatenate([zr, zero], axis=0)
    logits = jax.nn.log_softmax(zf + zr, axis=-1)
    return jnp.transpose(logits, (1, 0, 2))


# ----------------------------------------------------------------------------
# Deterministic parameter init (matching module __init__ shapes).
# cfg.input_dim = vocab, embedding dim E = vocab - 1, padding_idx = vocab - 1.
# ----------------------------------------------------------------------------
def init_params(key, vocab, hidden, num_layers):
    E = vocab - 1
    keys = jax.random.split(key, 3 + 3 * num_layers)
    embed = 0.1 * jax.random.normal(keys[0], (vocab, E), jnp.float32)
    embed = embed.at[vocab - 1].set(0.0)                      # padding_idx row
    lstm = []
    d_in = E
    for l in range(num_layers):
        k1, k2, k3 = keys[1 + 3 * l], keys[2 + 3 * l], keys[3 + 3 * l]
        wih = 0.1 * jax.random.normal(k1, (d_in, 4 * hidden), jnp.float32)   # W_ih^T
        whh = 0.1 * jax.random.normal(k2, (hidden, 4 * hidden), jnp.float32) # W_hh^T
        b = 0.1 * jax.random.normal(k3, (1, 4 * hidden), jnp.float32)        # b_ih+b_hh
        lstm.append((wih, whh, b))
        d_in = hidden
    dec_w = 0.1 * jax.random.normal(keys[-2], (hidden, E), jnp.float32)      # Linear W^T
    dec_b = 0.1 * jax.random.normal(keys[-1], (1, E), jnp.float32)
    return {"embed": embed, "lstm": lstm, "dec_w": dec_w, "dec_b": dec_b}


if __name__ == "__main__":
    vocab, hidden, num_layers = 33, 32, 2   # cfg.input_dim=33 -> E=32, cfg.hidden_dim=32
    B, L = 4, 8

    key = jax.random.PRNGKey(0)
    pkey, xkey = jax.random.split(key, 2)
    params = init_params(pkey, vocab, hidden, num_layers)
    x = jax.random.randint(xkey, (B, L), 0, vocab, dtype=jnp.int32)
    lengths = jnp.full((B,), L, dtype=jnp.int32)   # unused by forward (matches PyTorch)

    logits = jax.block_until_ready(p_elmo_lm_forward(params, x, lengths))
    ref = jax.block_until_ready(reference_forward(params, x))

    assert logits.shape == (B, L, vocab - 1), logits.shape
    np.testing.assert_allclose(np.asarray(logits), np.asarray(ref),
                               atol=1e-2, rtol=1e-2)
    print("KERNEL_OK")
</pallas_src>

<mosaic_0001>
module attributes {stable_mosaic.version = 11 : i64} {
  func.func @_lstm_stack_kernel(%arg0: memref<56x32xbf16, #tpu.memory_space<vmem>>, %arg1: memref<32x128xbf16, #tpu.memory_space<vmem>>, %arg2: memref<32x128xbf16, #tpu.memory_space<vmem>>, %arg3: memref<1x128xf32, #tpu.memory_space<vmem>>, %arg4: memref<32x128xbf16, #tpu.memory_space<vmem>>, %arg5: memref<32x128xbf16, #tpu.memory_space<vmem>>, %arg6: memref<1x128xf32, #tpu.memory_space<vmem>>, %arg7: memref<56x32xf32, #tpu.memory_space<vmem>>, %arg8: memref<56x128xf32, #tpu.memory_space<vmem>>) attributes {dimension_semantics = [], scalar_prefetch = 0 : i64, scratch_operands = 1 : i64, tpu.core_type = #tpu.core_type<tc>} {
    %c0 = arith.constant 0 : index
    %c0_0 = arith.constant 0 : index
    %0 = vector.load %arg0[%c0, %c0_0] : memref<56x32xbf16, #tpu.memory_space<vmem>>, vector<56x32xbf16>
    %c0_1 = arith.constant 0 : index
    %c0_2 = arith.constant 0 : index
    %1 = vector.load %arg1[%c0_1, %c0_2] : memref<32x128xbf16, #tpu.memory_space<vmem>>, vector<32x128xbf16>
    %cst = arith.constant dense<0.000000e+00> : vector<56x128xf32>
    %2 = tpu.matmul %0, %1, %cst {dimension_numbers = #tpu.dot_dimension_numbers<[1], [0], [0], [1], [0, 0, 1, 1], [], []>} : vector<56x32xbf16>, vector<32x128xbf16>, vector<56x128xf32> -> vector<56x128xf32>
    %c0_3 = arith.constant 0 : index
    %c0_4 = arith.constant 0 : index
    %3 = vector.load %arg3[%c0_3, %c0_4] : memref<1x128xf32, #tpu.memory_space<vmem>>, vector<1x128xf32>
    %4 = vector.broadcast %3 : vector<1x128xf32> to vector<56x128xf32>
    %5 = arith.addf %2, %4 : vector<56x128xf32>
    %c0_5 = arith.constant 0 : index
    %c0_6 = arith.constant 0 : index
    %6 = vector.load %arg8[%c0_5, %c0_6] : memref<56x128xf32, #tpu.memory_space<vmem>>, vector<56x128xf32>
    tpu.vector_store %arg8[%c0_5, %c0_6], %5 {strides = array<i32>} : memref<56x128xf32, #tpu.memory_space<vmem>>, vector<56x128xf32>,
    %c0_7 = arith.constant 0 : index
    %c0_8 = arith.constant 0 : index
    %7 = vector.load %arg2[%c0_7, %c0_8] : memref<32x128xbf16, #tpu.memory_space<vmem>>, vector<32x128xbf16>
    %cst_9 = arith.constant 0.000000e+00 : f32
    %8 = vector.broadcast %cst_9 : f32 to vector<8x32xf32>
    %cst_10 = arith.constant 0.000000e+00 : f32
    %9 = vector.broadcast %cst_10 : f32 to vector<8x32xf32>
    %c0_i32 = arith.constant 0 : i32
    %c8_i32 = arith.constant 8 : i32
    %10 = arith.muli %c0_i32, %c8_i32 : i32
    %11 = arith.index_cast %10 : i32 to index
    %c0_11 = arith.constant 0 : index
    %12 = vector.load %arg8[%11, %c0_11] : memref<56x128xf32, #tpu.memory_space<vmem>>, vector<8x128xf32>
    %13 = arith.truncf %8 : vector<8x32xf32> to vector<8x32xbf16>
    %cst_12 = arith.constant dense<0.000000e+00> : vector<8x128xf32>
    %14 = tpu.matmul %13, %7, %cst_12 {dimension_numbers = #tpu.dot_dimension_numbers<[1], [0], [0], [1], [0, 0, 1, 1], [], []>} : vector<8x32xbf16>, vector<32x128xbf16>, vector<8x128xf32> -> vector<8x128xf32>
    %15 = arith.addf %12, %14 : vector<8x128xf32>
    %16 = vector.extract_strided_slice %15 {offsets = [0, 0], sizes = [8, 32], strides = [1, 1]} : vector<8x128xf32> to vector<8x32xf32>
    %17 = arith.negf %16 : vector<8x32xf32>
    %18 = math.exp %17 : vector<8x32xf32>
    %cst_13 = arith.constant 1.000000e+00 : f32
    %19 = vector.broadcast %cst_13 : f32 to vector<8x32xf32>
    %20 = arith.addf %19, %18 : vector<8x32xf32>
    %21 = arith.divf %19, %20 : vector<8x32xf32>
    %22 = vector.extract_strided_slice %15 {offsets = [0, 32], sizes = [8, 32], strides = [1, 1]} : vector<8x128xf32> to vector<8x32xf32>
    %23 = arith.negf %22 : vector<8x32xf32>
    %24 = math.exp %23 : vector<8x32xf32>
    %cst_14 = arith.constant 1.000000e+00 : f32
    %25 = vector.broadcast %cst_14 : f32 to vector<8x32xf32>
    %26 = arith.addf %25, %24 : vector<8x32xf32>
    %27 = arith.divf %25, %26 : vector<8x32xf32>
    %28 = vector.extract_strided_slice %15 {offsets = [0, 64], sizes = [8, 32], strides = [1, 1]} : vector<8x128xf32> to vector<8x32xf32>
    %29 = math.tanh %28 : vector<8x32xf32>
    %30 = vector.extract_strided_slice %15 {offsets = [0, 96], sizes = [8, 32], strides = [1, 1]} : vector<8x128xf32> to vector<8x32xf32>
    %31 = arith.negf %30 : vector<8x32xf32>
    %32 = math.exp %31 : vector<8x32xf32>
    %cst_15 = arith.constant 1.000000e+00 : f32
    %33 = vector.broadcast %cst_15 : f32 to vector<8x32xf32>
    %34 = arith.addf %33, %32 : vector<8x32xf32>
    %35 = arith.divf %33, %34 : vector<8x32xf32>
    %36 = arith.mulf %27, %9 : vector<8x32xf32>
    %37 = arith.mulf %21, %29 : vector<8x32xf32>
    %38 = arith.addf %36, %37 : vector<8x32xf32>
    %39 = math.tanh %38 : vector<8x32xf32>
    %40 = arith.mulf %35, %39 : vector<8x32xf32>
    %41 = arith.index_cast %10 : i32 to index
    %c0_16 = arith.constant 0 : index
    %42 = vector.load %arg7[%41, %c0_16] : memref<56x32xf32, #tpu.memory_space<vmem>>, vector<8x32xf32>
    tpu.vector_store %arg7[%41, %c0_16], %40 {strides = array<i32>} : memref<56x32xf32, #tpu.memory_space<vmem>>, vector<8x32xf32>,
    %c1_i32 = arith.constant 1 : i32
    %c8_i32_17 = arith.constant 8 : i32
    %43 = arith.muli %c1_i32, %c8_i32_17 : i32
    %44 = arith.index_cast %43 : i32 to index
    %c0_18 = arith.constant 0 : index
    %45 = vector.load %arg8[%44, %c0_18] : memref<56x128xf32, #tpu.memory_space<vmem>>, vector<8x128xf32>
    %46 = arith.truncf %40 : vector<8x32xf32> to vector<8x32xbf16>
    %cst_19 = arith.constant dense<0.000000e+00> : vector<8x128xf32>
    %47 = tpu.matmul %46, %7, %cst_19 {dimension_numbers = #tpu.dot_dimension_numbers<[1], [0], [0], [1], [0, 0, 1, 1], [], []>} : vector<8x32xbf16>, vector<32x128xbf16>, vector<8x128xf32> -> vector<8x128xf32>
    %48 = arith.addf %45, %47 : vector<8x128xf32>
    %49 = vector.extract_strided_slice %48 {offsets = [0, 0], sizes = [8, 32], strides = [1, 1]} : vector<8x128xf32> to vector<8x32xf32>
    %50 = arith.negf %49 : vector<8x32xf32>
    %51 = math.exp %50 : vector<8x32xf32>
    %cst_20 = arith.constant 1.000000e+00 : f32
    %52 = vector.broadcast %cst_20 : f32 to vector<8x32xf32>
    %53 = arith.addf %52, %51 : vector<8x32xf32>
    %54 = arith.divf %52, %53 : vector<8x32xf32>
    %55 = vector.extract_strided_slice %48 {offsets = [0, 32], sizes = [8, 32], strides = [1, 1]} : vector<8x128xf32> to vector<8x32xf32>
    %56 = arith.negf %55 : vector<8x32xf32>
    %57 = math.exp %56 : vector<8x32xf32>
    %cst_21 = arith.constant 1.000000e+00 : f32
    %58 = vector.broadcast %cst_21 : f32 to vector<8x32xf32>
    %59 = arith.addf %58, %57 : vector<8x32xf32>
    %60 = arith.divf %58, %59 : vector<8x32xf32>
    %61 = vector.extract_strided_slice %48 {offsets = [0, 64], sizes = [8, 32], strides = [1, 1]} : vector<8x128xf32> to vector<8x32xf32>
    %62 = math.tanh %61 : vector<8x32xf32>
    %63 = vector.extract_strided_slice %48 {offsets = [0, 96], sizes = [8, 32], strides = [1, 1]} : vector<8x128xf32> to vector<8x32xf32>
    %64 = arith.negf %63 : vector<8x32xf32>
    %65 = math.exp %64 : vector<8x32xf32>
    %cst_22 = arith.constant 1.000000e+00 : f32
    %66 = vector.broadcast %cst_22 : f32 to vector<8x32xf32>
    %67 = arith.addf %66, %65 : vector<8x32xf32>
    %68 = arith.divf %66, %67 : vector<8x32xf32>
    %69 = arith.mulf %60, %38 : vector<8x32xf32>
    %70 = arith.mulf %54, %62 : vector<8x32xf32>
    %71 = arith.addf %69, %70 : vector<8x32xf32>
    %72 = math.tanh %71 : vector<8x32xf32>
    %73 = arith.mulf %68, %72 : vector<8x32xf32>
    %74 = arith.index_cast %43 : i32 to index
    %c0_23 = arith.constant 0 : index
    %75 = vector.load %arg7[%74, %c0_23] : memref<56x32xf32, #tpu.memory_space<vmem>>, vector<8x32xf32>
    tpu.vector_store %arg7[%74, %c0_23], %73 {strides = array<i32>} : memref<56x32xf32, #tpu.memory_space<vmem>>, vector<8x32xf32>,
    %c2_i32 = arith.constant 2 : i32
    %c8_i32_24 = arith.constant 8 : i32
    %76 = arith.muli %c2_i32, %c8_i32_24 : i32
    %77 = arith.index_cast %76 : i32 to index
    %c0_25 = arith.constant 0 : index
    %78 = vector.load %arg8[%77, %c0_25] : memref<56x128xf32, #tpu.memory_space<vmem>>, vector<8x128xf32>
    %79 = arith.truncf %73 : vector<8x32xf32> to vector<8x32xbf16>
    %cst_26 = arith.constant dense<0.000000e+00> : vector<8x128xf32>
    %80 = tpu.matmul %79, %7, %cst_26 {dimension_numbers = #tpu.dot_dimension_numbers<[1], [0], [0], [1], [0, 0, 1, 1], [], []>} : vector<8x32xbf16>, vector<32x128xbf16>, vector<8x128xf32> -> vector<8x128xf32>
    %81 = arith.addf %78, %80 : vector<8x128xf32>
    %82 = vector.extract_strided_slice %81 {offsets = [0, 0], sizes = [8, 32], strides = [1, 1]} : vector<8x128xf32> to vector<8x32xf32>
    %83 = arith.negf %82 : vector<8x32xf32>
    %84 = math.exp %83 : vector<8x32xf32>
    %cst_27 = arith.constant 1.000000e+00 : f32
    %85 = vector.broadcast %cst_27 : f32 to vector<8x32xf32>
    %86 = arith.addf %85, %84 : vector<8x32xf32>
    %87 = arith.divf %85, %86 : vector<8x32xf32>
    %88 = vector.extract_strided_slice %81 {offsets = [0, 32], sizes = [8, 32], strides = [1, 1]} : vector<8x128xf32> to vector<8x32xf32>
    %89 = arith.negf %88 : vector<8x32xf32>
    %90 = math.exp %89 : vector<8x32xf32>
    %cst_28 = arith.constant 1.000000e+00 : f32
    %91 = vector.broadcast %cst_28 : f32 to vector<8x32xf32>
    %92 = arith.addf %91, %90 : vector<8x32xf32>
    %93 = arith.divf %91, %92 : vector<8x32xf32>
    %94 = vector.extract_strided_slice %81 {offsets = [0, 64], sizes = [8, 32], strides = [1, 1]} : vector<8x128xf32> to vector<8x32xf32>
    %95 = math.tanh %94 : vector<8x32xf32>
    %96 = vector.extract_strided_slice %81 {offsets = [0, 96], sizes = [8, 32], strides = [1, 1]} : vector<8x128xf32> to vector<8x32xf32>
    %97 = arith.negf %96 : vector<8x32xf32>
    %98 = math.exp %97 : vector<8x32xf32>
    %cst_29 = arith.constant 1.000000e+00 : f32
    %99 = vector.broadcast %cst_29 : f32 to vector<8x32xf32>
    %100 = arith.addf %99, %98 : vector<8x32xf32>
    %101 = arith.divf %99, %100 : vector<8x32xf32>
    %102 = arith.mulf %93, %71 : vector<8x32xf32>
    %103 = arith.mulf %87, %95 : vector<8x32xf32>
    %104 = arith.addf %102, %103 : vector<8x32xf32>
    %105 = math.tanh %104 : vector<8x32xf32>
    %106 = arith.mulf %101, %105 : vector<8x32xf32>
    %107 = arith.index_cast %76 : i32 to index
    %c0_30 = arith.constant 0 : index
    %108 = vector.load %arg7[%107, %c0_30] : memref<56x32xf32, #tpu.memory_space<vmem>>, vector<8x32xf32>
    tpu.vector_store %arg7[%107, %c0_30], %106 {strides = array<i32>} : memref<56x32xf32, #tpu.memory_space<vmem>>, vector<8x32xf32>,
    %c3_i32 = arith.constant 3 : i32
    %c8_i32_31 = arith.constant 8 : i32
    %109 = arith.muli %c3_i32, %c8_i32_31 : i32
    %110 = arith.index_cast %109 : i32 to index
    %c0_32 = arith.constant 0 : index
    %111 = vector.load %arg8[%110, %c0_32] : memref<56x128xf32, #tpu.memory_space<vmem>>, vector<8x128xf32>
    %112 = arith.truncf %106 : vector<8x32xf32> to vector<8x32xbf16>
    %cst_33 = arith.constant dense<0.000000e+00> : vector<8x128xf32>
    %113 = tpu.matmul %112, %7, %cst_33 {dimension_numbers = #tpu.dot_dimension_numbers<[1], [0], [0], [1], [0, 0, 1, 1], [], []>} : vector<8x32xbf16>, vector<32x128xbf16>, vector<8x128xf32> -> vector<8x128xf32>
    %114 = arith.addf %111, %113 : vector<8x128xf32>
    %115 = vector.extract_strided_slice %114 {offsets = [0, 0], sizes = [8, 32], strides = [1, 1]} : vector<8x128xf32> to vector<8x32xf32>
    %116 = arith.negf %115 : vector<8x32xf32>
    %117 = math.exp %116 : vector<8x32xf32>
    %cst_34 = arith.constant 1.000000e+00 : f32
    %118 = vector.broadcast %cst_34 : f32 to vector<8x32xf32>
    %119 = arith.addf %118, %117 : vector<8x32xf32>
    %120 = arith.divf %118, %119 : vector<8x32xf32>
    %121 = vector.extract_strided_slice %114 {offsets = [0, 32], sizes = [8, 32], strides = [1, 1]} : vector<8x128xf32> to vector<8x32xf32>
    %122 = arith.negf %121 : vector<8x32xf32>
    %123 = math.exp %122 : vector<8x32xf32>
    %cst_35 = arith.constant 1.000000e+00 : f32
    %124 = vector.broadcast %cst_35 : f32 to vector<8x32xf32>
    %125 = arith.addf %124, %123 : vector<8x32xf32>
    %126 = arith.divf %124, %125 : vector<8x32xf32>
    %127 = vector.extract_strided_slice %114 {offsets = [0, 64], sizes = [8, 32], strides = [1, 1]} : vector<8x128xf32> to vector<8x32xf32>
    %128 = math.tanh %127 : vector<8x32xf32>
    %129 = vector.extract_strided_slice %114 {offsets = [0, 96], sizes = [8, 32], strides = [1, 1]} : vector<8x128xf32> to vector<8x32xf32>
    %130 = arith.negf %129 : vector<8x32xf32>
    %131 = math.exp %130 : vector<8x32xf32>
    %cst_36 = arith.constant 1.000000e+00 : f32
    %132 = vector.broadcast %cst_36 : f32 to vector<8x32xf32>
    %133 = arith.addf %132, %131 : vector<8x32xf32>
    %134 = arith.divf %132, %133 : vector<8x32xf32>
    %135 = arith.mulf %126, %104 : vector<8x32xf32>
    %136 = arith.mulf %120, %128 : vector<8x32xf32>
    %137 = arith.addf %135, %136 : vector<8x32xf32>
    %138 = math.tanh %137 : vector<8x32xf32>
    %139 = arith.mulf %134, %138 : vector<8x32xf32>
    %140 = arith.index_cast %109 : i32 to index
    %c0_37 = arith.constant 0 : index
    %141 = vector.load %arg7[%140, %c0_37] : memref<56x32xf32, #tpu.memory_space<vmem>>, vector<8x32xf32>
    tpu.vector_store %arg7[%140, %c0_37], %139 {strides = array<i32>} : memref<56x32xf32, #tpu.memory_space<vmem>>, vector<8x32xf32>,
    %c4_i32 = arith.constant 4 : i32
    %c8_i32_38 = arith.constant 8 : i32
    %142 = arith.muli %c4_i32, %c8_i32_38 : i32
    %143 = arith.index_cast %142 : i32 to index
    %c0_39 = arith.constant 0 : index
    %144 = vector.load %arg8[%143, %c0_39] : memref<56x128xf32, #tpu.memory_space<vmem>>, vector<8x128xf32>
    %145 = arith.truncf %139 : vector<8x32xf32> to vector<8x32xbf16>
    %cst_40 = arith.constant dense<0.000000e+00> : vector<8x128xf32>
    %146 = tpu.matmul %145, %7, %cst_40 {dimension_numbers = #tpu.dot_dimension_numbers<[1], [0], [0], [1], [0, 0, 1, 1], [], []>} : vector<8x32xbf16>, vector<32x128xbf16>, vector<8x128xf32> -> vector<8x128xf32>
    %147 = arith.addf %144, %146 : vector<8x128xf32>
    %148 = vector.extract_strided_slice %147 {offsets = [0, 0], sizes = [8, 32], strides = [1, 1]} : vector<8x128xf32> to vector<8x32xf32>
    %149 = arith.negf %148 : vector<8x32xf32>
    %150 = math.exp %149 : vector<8x32xf32>
    %cst_41 = arith.constant 1.000000e+00 : f32
    %151 = vector.broadcast %cst_41 : f32 to vector<8x32xf32>
    %152 = arith.addf %151, %150 : vector<8x32xf32>
    %153 = arith.divf %151, %152 : vector<8x32xf32>
    %154 = vector.extract_strided_slice %147 {offsets = [0, 32], sizes = [8, 32], strides = [1, 1]} : vector<8x128xf32> to vector<8x32xf32>
    %155 = arith.negf %154 : vector<8x32xf32>
    %156 = math.exp %155 : vector<8x32xf32>
    %cst_42 = arith.constant 1.000000e+00 : f32
    %157 = vector.broadcast %cst_42 : f32 to vector<8x32xf32>
    %158 = arith.addf %157, %156 : vector<8x32xf32>
    %159 = arith.divf %157, %158 : vector<8x32xf32>
    %160 = vector.extract_strided_slice %147 {offsets = [0, 64], sizes = [8, 32], strides = [1, 1]} : vector<8x128xf32> to vector<8x32xf32>
    %161 = math.tanh %160 : vector<8x32xf32>
    %162 = vector.extract_strided_slice %147 {offsets = [0, 96], sizes = [8, 32], strides = [1, 1]} : vector<8x128xf32> to vector<8x32xf32>
    %163 = arith.negf %162 : vector<8x32xf32>
    %164 = math.exp %163 : vector<8x32xf32>
    %cst_43 = arith.constant 1.000000e+00 : f32
    %165 = vector.broadcast %cst_43 : f32 to vector<8x32xf32>
    %166 = arith.addf %165, %164 : vector<8x32xf32>
    %167 = arith.divf %165, %166 : vector<8x32xf32>
    %168 = arith.mulf %159, %137 : vector<8x32xf32>
    %169 = arith.mulf %153, %161 : vector<8x32xf32>
    %170 = arith.addf %168, %169 : vector<8x32xf32>
    %171 = math.tanh %170 : vector<8x32xf32>
    %172 = arith.mulf %167, %171 : vector<8x32xf32>
    %173 = arith.index_cast %142 : i32 to index
    %c0_44 = arith.constant 0 : index
    %174 = vector.load %arg7[%173, %c0_44] : memref<56x32xf32, #tpu.memory_space<vmem>>, vector<8x32xf32>
    tpu.vector_store %arg7[%173, %c0_44], %172 {strides = array<i32>} : memref<56x32xf32, #tpu.memory_space<vmem>>, vector<8x32xf32>,
    %c5_i32 = arith.constant 5 : i32
    %c8_i32_45 = arith.constant 8 : i32
    %175 = arith.muli %c5_i32, %c8_i32_45 : i32
    %176 = arith.index_cast %175 : i32 to index
    %c0_46 = arith.constant 0 : index
    %177 = vector.load %arg8[%176, %c0_46] : memref<56x128xf32, #tpu.memory_space<vmem>>, vector<8x128xf32>
    %178 = arith.truncf %172 : vector<8x32xf32> to vector<8x32xbf16>
    %cst_47 = arith.constant dense<0.000000e+00> : vector<8x128xf32>
    %179 = tpu.matmul %178, %7, %cst_47 {dimension_numbers = #tpu.dot_dimension_numbers<[1], [0], [0], [1], [0, 0, 1, 1], [], []>} : vector<8x32xbf16>, vector<32x128xbf16>, vector<8x128xf32> -> vector<8x128xf32>
    %180 = arith.addf %177, %179 : vector<8x128xf32>
    %181 = vector.extract_strided_slice %180 {offsets = [0, 0], sizes = [8, 32], strides = [1, 1]} : vector<8x128xf32> to vector<8x32xf32>
    %182 = arith.negf %181 : vector<8x32xf32>
    %183 = math.exp %182 : vector<8x32xf32>
    %cst_48 = arith.constant 1.000000e+00 : f32
    %184 = vector.broadcast %cst_48 : f32 to vector<8x32xf32>
    %185 = arith.addf %184, %183 : vector<8x32xf32>
    %186 = arith.divf %184, %185 : vector<8x32xf32>
    %187 = vector.extract_strided_slice %180 {offsets = [0, 32], sizes = [8, 32], strides = [1, 1]} : vector<8x128xf32> to vector<8x32xf32>
    %188 = arith.negf %187 : vector<8x32xf32>
    %189 = math.exp %188 : vector<8x32xf32>
    %cst_49 = arith.constant 1.000000e+00 : f32
    %190 = vector.broadcast %cst_49 : f32 to vector<8x32xf32>
    %191 = arith.addf %190, %189 : vector<8x32xf32>
    %192 = arith.divf %190, %191 : vector<8x32xf32>
    %193 = vector.extract_strided_slice %180 {offsets = [0, 64], sizes = [8, 32], strides = [1, 1]} : vector<8x128xf32> to vector<8x32xf32>
    %194 = math.tanh %193 : vector<8x32xf32>
    %195 = vector.extract_strided_slice %180 {offsets = [0, 96], sizes = [8, 32], strides = [1, 1]} : vector<8x128xf32> to vector<8x32xf32>
    %196 = arith.negf %195 : vector<8x32xf32>
    %197 = math.exp %196 : vector<8x32xf32>
    %cst_50 = arith.constant 1.000000e+00 : f32
    %198 = vector.broadcast %cst_50 : f32 to vector<8x32xf32>
    %199 = arith.addf %198, %197 : vector<8x32xf32>
    %200 = arith.divf %198, %199 : vector<8x32xf32>
    %201 = arith.mulf %192, %170 : vector<8x32xf32>
    %202 = arith.mulf %186, %194 : vector<8x32xf32>
    %203 = arith.addf %201, %202 : vector<8x32xf32>
    %204 = math.tanh %203 : vector<8x32xf32>
    %205 = arith.mulf %200, %204 : vector<8x32xf32>
    %206 = arith.index_cast %175 : i32 to index
    %c0_51 = arith.constant 0 : index
    %207 = vector.load %arg7[%206, %c0_51] : memref<56x32xf32, #tpu.memory_space<vmem>>, vector<8x32xf32>
    tpu.vector_store %arg7[%206, %c0_51], %205 {strides = array<i32>} : memref<56x32xf32, #tpu.memory_space<vmem>>, vector<8x32xf32>,
    %c6_i32 = arith.constant 6 : i32
    %c8_i32_52 = arith.constant 8 : i32
    %208 = arith.muli %c6_i32, %c8_i32_52 : i32
    %209 = arith.index_cast %208 : i32 to index
    %c0_53 = arith.constant 0 : index
    %210 = vector.load %arg8[%209, %c0_53] : memref<56x128xf32, #tpu.memory_space<vmem>>, vector<8x128xf32>
    %211 = arith.truncf %205 : vector<8x32xf32> to vector<8x32xbf16>
    %cst_54 = arith.constant dense<0.000000e+00> : vector<8x128xf32>
    %212 = tpu.matmul %211, %7, %cst_54 {dimension_numbers = #tpu.dot_dimension_numbers<[1], [0], [0], [1], [0, 0, 1, 1], [], []>} : vector<8x32xbf16>, vector<32x128xbf16>, vector<8x128xf32> -> vector<8x128xf32>
    %213 = arith.addf %210, %212 : vector<8x128xf32>
    %214 = vector.extract_strided_slice %213 {offsets = [0, 0], sizes = [8, 32], strides = [1, 1]} : vector<8x128xf32> to vector<8x32xf32>
    %215 = arith.negf %214 : vector<8x32xf32>
    %216 = math.exp %215 : vector<8x32xf32>
    %cst_55 = arith.constant 1.000000e+00 : f32
    %217 = vector.broadcast %cst_55 : f32 to vector<8x32xf32>
    %218 = arith.addf %217, %216 : vector<8x32xf32>
    %219 = arith.divf %217, %218 : vector<8x32xf32>
    %220 = vector.extract_strided_slice %213 {offsets = [0, 32], sizes = [8, 32], strides = [1, 1]} : vector<8x128xf32> to vector<8x32xf32>
    %221 = arith.negf %220 : vector<8x32xf32>
    %222 = math.exp %221 : vector<8x32xf32>
    %cst_56 = arith.constant 1.000000e+00 : f32
    %223 = vector.broadcast %cst_56 : f32 to vector<8x32xf32>
    %224 = arith.addf %223, %222 : vector<8x32xf32>
    %225 = arith.divf %223, %224 : vector<8x32xf32>
    %226 = vector.extract_strided_slice %213 {offsets = [0, 64], sizes = [8, 32], strides = [1, 1]} : vector<8x128xf32> to vector<8x32xf32>
    %227 = math.tanh %226 : vector<8x32xf32>
    %228 = vector.extract_strided_slice %213 {offsets = [0, 96], sizes = [8, 32], strides = [1, 1]} : vector<8x128xf32> to vector<8x32xf32>
    %229 = arith.negf %228 : vector<8x32xf32>
    %230 = math.exp %229 : vector<8x32xf32>
    %cst_57 = arith.constant 1.000000e+00 : f32
    %231 = vector.broadcast %cst_57 : f32 to vector<8x32xf32>
    %232 = arith.addf %231, %230 : vector<8x32xf32>
    %233 = arith.divf %231, %232 : vector<8x32xf32>
    %234 = arith.mulf %225, %203 : vector<8x32xf32>
    %235 = arith.mulf %219, %227 : vector<8x32xf32>
    %236 = arith.addf %234, %235 : vector<8x32xf32>
    %237 = math.tanh %236 : vector<8x32xf32>
    %238 = arith.mulf %233, %237 : vector<8x32xf32>
    %239 = arith.index_cast %208 : i32 to index
    %c0_58 = arith.constant 0 : index
    %240 = vector.load %arg7[%239, %c0_58] : memref<56x32xf32, #tpu.memory_space<vmem>>, vector<8x32xf32>
    tpu.vector_store %arg7[%239, %c0_58], %238 {strides = array<i32>} : memref<56x32xf32, #tpu.memory_space<vmem>>, vector<8x32xf32>,
    %c7_i32 = arith.constant 7 : i32
    %c0_59 = arith.constant 0 : index
    %c0_60 = arith.constant 0 : index
    %241 = vector.load %arg7[%c0_59, %c0_60] : memref<56x32xf32, #tpu.memory_space<vmem>>, vector<56x32xf32>
    %242 = arith.truncf %241 : vector<56x32xf32> to vector<56x32xbf16>
    %c0_61 = arith.constant 0 : index
    %c0_62 = arith.constant 0 : index
    %243 = vector.load %arg4[%c0_61, %c0_62] : memref<32x128xbf16, #tpu.memory_space<vmem>>, vector<32x128xbf16>
    %cst_63 = arith.constant dense<0.000000e+00> : vector<56x128xf32>
    %244 = tpu.matmul %242, %243, %cst_63 {dimension_numbers = #tpu.dot_dimension_numbers<[1], [0], [0], [1], [0, 0, 1, 1], [], []>} : vector<56x32xbf16>, vector<32x128xbf16>, vector<56x128xf32> -> vector<56x128xf32>
    %c0_64 = arith.constant 0 : index
    %c0_65 = arith.constant 0 : index
    %245 = vector.load %arg6[%c0_64, %c0_65] : memref<1x128xf32, #tpu.memory_space<vmem>>, vector<1x128xf32>
    %246 = vector.broadcast %245 : vector<1x128xf32> to vector<56x128xf32>
    %247 = arith.addf %244, %246 : vector<56x128xf32>
    %c0_66 = arith.constant 0 : index
    %c0_67 = arith.constant 0 : index
    %248 = vector.load %arg8[%c0_66, %c0_67] : memref<56x128xf32, #tpu.memory_space<vmem>>, vector<56x128xf32>
    tpu.vector_store %arg8[%c0_66, %c0_67], %247 {strides = array<i32>} : memref<56x128xf32, #tpu.memory_space<vmem>>, vector<56x128xf32>,
    %c0_68 = arith.constant 0 : index
    %c0_69 = arith.constant 0 : index
    %249 = vector.load %arg5[%c0_68, %c0_69] : memref<32x128xbf16, #tpu.memory_space<vmem>>, vector<32x128xbf16>
    %cst_70 = arith.constant 0.000000e+00 : f32
    %250 = vector.broadcast %cst_70 : f32 to vector<8x32xf32>
    %cst_71 = arith.constant 0.000000e+00 : f32
    %251 = vector.broadcast %cst_71 : f32 to vector<8x32xf32>
    %c0_i32_72 = arith.constant 0 : i32
    %c8_i32_73 = arith.constant 8 : i32
    %252 = arith.muli %c0_i32_72, %c8_i32_73 : i32
    %253 = arith.index_cast %252 : i32 to index
    %c0_74 = arith.constant 0 : index
    %254 = vector.load %arg8[%253, %c0_74] : memref<56x128xf32, #tpu.memory_space<vmem>>, vector<8x128xf32>
    %255 = arith.truncf %250 : vector<8x32xf32> to vector<8x32xbf16>
    %cst_75 = arith.constant dense<0.000000e+00> : vector<8x128xf32>
    %256 = tpu.matmul %255, %249, %cst_75 {dimension_numbers = #tpu.dot_dimension_numbers<[1], [0], [0], [1], [0, 0, 1, 1], [], []>} : vector<8x32xbf16>, vector<32x128xbf16>, vector<8x128xf32> -> vector<8x128xf32>
    %257 = arith.addf %254, %256 : vector<8x128xf32>
    %258 = vector.extract_strided_slice %257 {offsets = [0, 0], sizes = [8, 32], strides = [1, 1]} : vector<8x128xf32> to vector<8x32xf32>
    %259 = arith.negf %258 : vector<8x32xf32>
    %260 = math.exp %259 : vector<8x32xf32>
    %cst_76 = arith.constant 1.000000e+00 : f32
    %261 = vector.broadcast %cst_76 : f32 to vector<8x32xf32>
    %262 = arith.addf %261, %260 : vector<8x32xf32>
    %263 = arith.divf %261, %262 : vector<8x32xf32>
    %264 = vector.extract_strided_slice %257 {offsets = [0, 32], sizes = [8, 32], strides = [1, 1]} : vector<8x128xf32> to vector<8x32xf32>
    %265 = arith.negf %264 : vector<8x32xf32>
    %266 = math.exp %265 : vector<8x32xf32>
    %cst_77 = arith.constant 1.000000e+00 : f32
    %267 = vector.broadcast %cst_77 : f32 to vector<8x32xf32>
    %268 = arith.addf %267, %266 : vector<8x32xf32>
    %269 = arith.divf %267, %268 : vector<8x32xf32>
    %270 = vector.extract_strided_slice %257 {offsets = [0, 64], sizes = [8, 32], strides = [1, 1]} : vector<8x128xf32> to vector<8x32xf32>
    %271 = math.tanh %270 : vector<8x32xf32>
    %272 = vector.extract_strided_slice %257 {offsets = [0, 96], sizes = [8, 32], strides = [1, 1]} : vector<8x128xf32> to vector<8x32xf32>
    %273 = arith.negf %272 : vector<8x32xf32>
    %274 = math.exp %273 : vector<8x32xf32>
    %cst_78 = arith.constant 1.000000e+00 : f32
    %275 = vector.broadcast %cst_78 : f32 to vector<8x32xf32>
    %276 = arith.addf %275, %274 : vector<8x32xf32>
    %277 = arith.divf %275, %276 : vector<8x32xf32>
    %278 = arith.mulf %269, %251 : vector<8x32xf32>
    %279 = arith.mulf %263, %271 : vector<8x32xf32>
    %280 = arith.addf %278, %279 : vector<8x32xf32>
    %281 = math.tanh %280 : vector<8x32xf32>
    %282 = arith.mulf %277, %281 : vector<8x32xf32>
    %283 = arith.index_cast %252 : i32 to index
    %c0_79 = arith.constant 0 : index
    %284 = vector.load %arg7[%283, %c0_79] : memref<56x32xf32, #tpu.memory_space<vmem>>, vector<8x32xf32>
    tpu.vector_store %arg7[%283, %c0_79], %282 {strides = array<i32>} : memref<56x32xf32, #tpu.memory_space<vmem>>, vector<8x32xf32>,
    %c1_i32_80 = arith.constant 1 : i32
    %c8_i32_81 = arith.constant 8 : i32
    %285 = arith.muli %c1_i32_80, %c8_i32_81 : i32
    %286 = arith.index_cast %285 : i32 to index
    %c0_82 = arith.constant 0 : index
    %287 = vector.load %arg8[%286, %c0_82] : memref<56x128xf32, #tpu.memory_space<vmem>>, vector<8x128xf32>
    %288 = arith.truncf %282 : vector<8x32xf32> to vector<8x32xbf16>
    %cst_83 = arith.constant dense<0.000000e+00> : vector<8x128xf32>
    %289 = tpu.matmul %288, %249, %cst_83 {dimension_numbers = #tpu.dot_dimension_numbers<[1], [0], [0], [1], [0, 0, 1, 1], [], []>} : vector<8x32xbf16>, vector<32x128xbf16>, vector<8x128xf32> -> vector<8x128xf32>
    %290 = arith.addf %287, %289 : vector<8x128xf32>
    %291 = vector.extract_strided_slice %290 {offsets = [0, 0], sizes = [8, 32], strides = [1, 1]} : vector<8x128xf32> to vector<8x32xf32>
    %292 = arith.negf %291 : vector<8x32xf32>
    %293 = math.exp %292 : vector<8x32xf32>
    %cst_84 = arith.constant 1.000000e+00 : f32
    %294 = vector.broadcast %cst_84 : f32 to vector<8x32xf32>
    %295 = arith.addf %294, %293 : vector<8x32xf32>
    %296 = arith.divf %294, %295 : vector<8x32xf32>
    %297 = vector.extract_strided_slice %290 {offsets = [0, 32], sizes = [8, 32], strides = [1, 1]} : vector<8x128xf32> to vector<8x32xf32>
    %298 = arith.negf %297 : vector<8x32xf32>
    %299 = math.exp %298 : vector<8x32xf32>
    %cst_85 = arith.constant 1.000000e+00 : f32
    %300 = vector.broadcast %cst_85 : f32 to vector<8x32xf32>
    %301 = arith.addf %300, %299 : vector<8x32xf32>
    %302 = arith.divf %300, %301 : vector<8x32xf32>
    %303 = vector.extract_strided_slice %290 {offsets = [0, 64], sizes = [8, 32], strides = [1, 1]} : vector<8x128xf32> to vector<8x32xf32>
    %304 = math.tanh %303 : vector<8x32xf32>
    %305 = vector.extract_strided_slice %290 {offsets = [0, 96], sizes = [8, 32], strides = [1, 1]} : vector<8x128xf32> to vector<8x32xf32>
    %306 = arith.negf %305 : vector<8x32xf32>
    %307 = math.exp %306 : vector<8x32xf32>
    %cst_86 = arith.constant 1.000000e+00 : f32
    %308 = vector.broadcast %cst_86 : f32 to vector<8x32xf32>
    %309 = arith.addf %308, %307 : vector<8x32xf32>
    %310 = arith.divf %308, %309 : vector<8x32xf32>
    %311 = arith.mulf %302, %280 : vector<8x32xf32>
    %312 = arith.mulf %296, %304 : vector<8x32xf32>
    %313 = arith.addf %311, %312 : vector<8x32xf32>
    %314 = math.tanh %313 : vector<8x32xf32>
    %315 = arith.mulf %310, %314 : vector<8x32xf32>
    %316 = arith.index_cast %285 : i32 to index
    %c0_87 = arith.constant 0 : index
    %317 = vector.load %arg7[%316, %c0_87] : memref<56x32xf32, #tpu.memory_space<vmem>>, vector<8x32xf32>
    tpu.vector_store %arg7[%316, %c0_87], %315 {strides = array<i32>} : memref<56x32xf32, #tpu.memory_space<vmem>>, vector<8x32xf32>,
    %c2_i32_88 = arith.constant 2 : i32
    %c8_i32_89 = arith.constant 8 : i32
    %318 = arith.muli %c2_i32_88, %c8_i32_89 : i32
    %319 = arith.index_cast %318 : i32 to index
    %c0_90 = arith.constant 0 : index
    %320 = vector.load %arg8[%319, %c0_90] : memref<56x128xf32, #tpu.memory_space<vmem>>, vector<8x128xf32>
    %321 = arith.truncf %315 : vector<8x32xf32> to vector<8x32xbf16>
    %cst_91 = arith.constant dense<0.000000e+00> : vector<8x128xf32>
    %322 = tpu.matmul %321, %249, %cst_91 {dimension_numbers = #tpu.dot_dimension_numbers<[1], [0], [0], [1], [0, 0, 1, 1], [], []>} : vector<8x32xbf16>, vector<32x128xbf16>, vector<8x128xf32> -> vector<8x128xf32>
    %323 = arith.addf %320, %322 : vector<8x128xf32>
    %324 = vector.extract_strided_slice %323 {offsets = [0, 0], sizes = [8, 32], strides = [1, 1]} : vector<8x128xf32> to vector<8x32xf32>
    %325 = arith.negf %324 : vector<8x32xf32>
    %326 = math.exp %325 : vector<8x32xf32>
    %cst_92 = arith.constant 1.000000e+00 : f32
    %327 = vector.broadcast %cst_92 : f32 to vector<8x32xf32>
    %328 = arith.addf %327, %326 : vector<8x32xf32>
    %329 = arith.divf %327, %328 : vector<8x32xf32>
    %330 = vector.extract_strided_slice %323 {offsets = [0, 32], sizes = [8, 32], strides = [1, 1]} : vector<8x128xf32> to vector<8x32xf32>
    %331 = arith.negf %330 : vector<8x32xf32>
    %332 = math.exp %331 : vector<8x32xf32>
    %cst_93 = arith.constant 1.000000e+00 : f32
    %333 = vector.broadcast %cst_93 : f32 to vector<8x32xf32>
    %334 = arith.addf %333, %332 : vector<8x32xf32>
    %335 = arith.divf %333, %334 : vector<8x32xf32>
    %336 = vector.extract_strided_slice %323 {offsets = [0, 64], sizes = [8, 32], strides = [1, 1]} : vector<8x128xf32> to vector<8x32xf32>
    %337 = math.tanh %336 : vector<8x32xf32>
    %338 = vector.extract_strided_slice %323 {offsets = [0, 96], sizes = [8, 32], strides = [1, 1]} : vector<8x128xf32> to vector<8x32xf32>
    %339 = arith.negf %338 : vector<8x32xf32>
    %340 = math.exp %339 : vector<8x32xf32>
    %cst_94 = arith.constant 1.000000e+00 : f32
    %341 = vector.broadcast %cst_94 : f32 to vector<8x32xf32>
    %342 = arith.addf %341, %340 : vector<8x32xf32>
    %343 = arith.divf %341, %342 : vector<8x32xf32>
    %344 = arith.mulf %335, %313 : vector<8x32xf32>
    %345 = arith.mulf %329, %337 : vector<8x32xf32>
    %346 = arith.addf %344, %345 : vector<8x32xf32>
    %347 = math.tanh %346 : vector<8x32xf32>
    %348 = arith.mulf %343, %347 : vector<8x32xf32>
    %349 = arith.index_cast %318 : i32 to index
    %c0_95 = arith.constant 0 : index
    %350 = vector.load %arg7[%349, %c0_95] : memref<56x32xf32, #tpu.memory_space<vmem>>, vector<8x32xf32>
    tpu.vector_store %arg7[%349, %c0_95], %348 {strides = array<i32>} : memref<56x32xf32, #tpu.memory_space<vmem>>, vector<8x32xf32>,
    %c3_i32_96 = arith.constant 3 : i32
    %c8_i32_97 = arith.constant 8 : i32
    %351 = arith.muli %c3_i32_96, %c8_i32_97 : i32
    %352 = arith.index_cast %351 : i32 to index
    %c0_98 = arith.constant 0 : index
    %353 = vector.load %arg8[%352, %c0_98] : memref<56x128xf32, #tpu.memory_space<vmem>>, vector<8x128xf32>
    %354 = arith.truncf %348 : vector<8x32xf32> to vector<8x32xbf16>
    %cst_99 = arith.constant dense<0.000000e+00> : vector<8x128xf32>
    %355 = tpu.matmul %354, %249, %cst_99 {dimension_numbers = #tpu.dot_dimension_numbers<[1], [0], [0], [1], [0, 0, 1, 1], [], []>} : vector<8x32xbf16>, vector<32x128xbf16>, vector<8x128xf32> -> vector<8x128xf32>
    %356 = arith.addf %353, %355 : vector<8x128xf32>
    %357 = vector.extract_strided_slice %356 {offsets = [0, 0], sizes = [8, 32], strides = [1, 1]} : vector<8x128xf32> to vector<8x32xf32>
    %358 = arith.negf %357 : vector<8x32xf32>
    %359 = math.exp %358 : vector<8x32xf32>
    %cst_100 = arith.constant 1.000000e+00 : f32
    %360 = vector.broadcast %cst_100 : f32 to vector<8x32xf32>
    %361 = arith.addf %360, %359 : vector<8x32xf32>
    %362 = arith.divf %360, %361 : vector<8x32xf32>
    %363 = vector.extract_strided_slice %356 {offsets = [0, 32], sizes = [8, 32], strides = [1, 1]} : vector<8x128xf32> to vector<8x32xf32>
    %364 = arith.negf %363 : vector<8x32xf32>
    %365 = math.exp %364 : vector<8x32xf32>
    %cst_101 = arith.constant 1.000000e+00 : f32
    %366 = vector.broadcast %cst_101 : f32 to vector<8x32xf32>
    %367 = arith.addf %366, %365 : vector<8x32xf32>
    %368 = arith.divf %366, %367 : vector<8x32xf32>
    %369 = vector.extract_strided_slice %356 {offsets = [0, 64], sizes = [8, 32], strides = [1, 1]} : vector<8x128xf32> to vector<8x32xf32>
    %370 = math.tanh %369 : vector<8x32xf32>
    %371 = vector.extract_strided_slice %356 {offsets = [0, 96], sizes = [8, 32], strides = [1, 1]} : vector<8x128xf32> to vector<8x32xf32>
    %372 = arith.negf %371 : vector<8x32xf32>
    %373 = math.exp %372 : vector<8x32xf32>
    %cst_102 = arith.constant 1.000000e+00 : f32
    %374 = vector.broadcast %cst_102 : f32 to vector<8x32xf32>
    %375 = arith.addf %374, %373 : vector<8x32xf32>
    %376 = arith.divf %374, %375 : vector<8x32xf32>
    %377 = arith.mulf %368, %346 : vector<8x32xf32>
    %378 = arith.mulf %362, %370 : vector<8x32xf32>
    %379 = arith.addf %377, %378 : vector<8x32xf32>
    %380 = math.tanh %379 : vector<8x32xf32>
    %381 = arith.mulf %376, %380 : vector<8x32xf32>
    %382 = arith.index_cast %351 : i32 to index
    %c0_103 = arith.constant 0 : index
    %383 = vector.load %arg7[%382, %c0_103] : memref<56x32xf32, #tpu.memory_space<vmem>>, vector<8x32xf32>
    tpu.vector_store %arg7[%382, %c0_103], %381 {strides = array<i32>} : memref<56x32xf32, #tpu.memory_space<vmem>>, vector<8x32xf32>,
    %c4_i32_104 = arith.constant 4 : i32
    %c8_i32_105 = arith.constant 8 : i32
    %384 = arith.muli %c4_i32_104, %c8_i32_105 : i32
    %385 = arith.index_cast %384 : i32 to index
    %c0_106 = arith.constant 0 : index
    %386 = vector.load %arg8[%385, %c0_106] : memref<56x128xf32, #tpu.memory_space<vmem>>, vector<8x128xf32>
    %387 = arith.truncf %381 : vector<8x32xf32> to vector<8x32xbf16>
    %cst_107 = arith.constant dense<0.000000e+00> : vector<8x128xf32>
    %388 = tpu.matmul %387, %249, %cst_107 {dimension_numbers = #tpu.dot_dimension_numbers<[1], [0], [0], [1], [0, 0, 1, 1], [], []>} : vector<8x32xbf16>, vector<32x128xbf16>, vector<8x128xf32> -> vector<8x128xf32>
    %389 = arith.addf %386, %388 : vector<8x128xf32>
    %390 = vector.extract_strided_slice %389 {offsets = [0, 0], sizes = [8, 32], strides = [1, 1]} : vector<8x128xf32> to vector<8x32xf32>
    %391 = arith.negf %390 : vector<8x32xf32>
    %392 = math.exp %391 : vector<8x32xf32>
    %cst_108 = arith.constant 1.000000e+00 : f32
    %393 = vector.broadcast %cst_108 : f32 to vector<8x32xf32>
    %394 = arith.addf %393, %392 : vector<8x32xf32>
    %395 = arith.divf %393, %394 : vector<8x32xf32>
    %396 = vector.extract_strided_slice %389 {offsets = [0, 32], sizes = [8, 32], strides = [1, 1]} : vector<8x128xf32> to vector<8x32xf32>
    %397 = arith.negf %396 : vector<8x32xf32>
    %398 = math.exp %397 : vector<8x32xf32>
    %cst_109 = arith.constant 1.000000e+00 : f32
    %399 = vector.broadcast %cst_109 : f32 to vector<8x32xf32>
    %400 = arith.addf %399, %398 : vector<8x32xf32>
    %401 = arith.divf %399, %400 : vector<8x32xf32>
    %402 = vector.extract_strided_slice %389 {offsets = [0, 64], sizes = [8, 32], strides = [1, 1]} : vector<8x128xf32> to vector<8x32xf32>
    %403 = math.tanh %402 : vector<8x32xf32>
    %404 = vector.extract_strided_slice %389 {offsets = [0, 96], sizes = [8, 32], strides = [1, 1]} : vector<8x128xf32> to vector<8x32xf32>
    %405 = arith.negf %404 : vector<8x32xf32>
    %406 = math.exp %405 : vector<8x32xf32>
    %cst_110 = arith.constant 1.000000e+00 : f32
    %407 = vector.broadcast %cst_110 : f32 to vector<8x32xf32>
    %408 = arith.addf %407, %406 : vector<8x32xf32>
    %409 = arith.divf %407, %408 : vector<8x32xf32>
    %410 = arith.mulf %401, %379 : vector<8x32xf32>
    %411 = arith.mulf %395, %403 : vector<8x32xf32>
    %412 = arith.addf %410, %411 : vector<8x32xf32>
    %413 = math.tanh %412 : vector<8x32xf32>
    %414 = arith.mulf %409, %413 : vector<8x32xf32>
    %415 = arith.index_cast %384 : i32 to index
    %c0_111 = arith.constant 0 : index
    %416 = vector.load %arg7[%415, %c0_111] : memref<56x32xf32, #tpu.memory_space<vmem>>, vector<8x32xf32>
    tpu.vector_store %arg7[%415, %c0_111], %414 {strides = array<i32>} : memref<56x32xf32, #tpu.memory_space<vmem>>, vector<8x32xf32>,
    %c5_i32_112 = arith.constant 5 : i32
    %c8_i32_113 = arith.constant 8 : i32
    %417 = arith.muli %c5_i32_112, %c8_i32_113 : i32
    %418 = arith.index_cast %417 : i32 to index
    %c0_114 = arith.constant 0 : index
    %419 = vector.load %arg8[%418, %c0_114] : memref<56x128xf32, #tpu.memory_space<vmem>>, vector<8x128xf32>
    %420 = arith.truncf %414 : vector<8x32xf32> to vector<8x32xbf16>
    %cst_115 = arith.constant dense<0.000000e+00> : vector<8x128xf32>
    %421 = tpu.matmul %420, %249, %cst_115 {dimension_numbers = #tpu.dot_dimension_numbers<[1], [0], [0], [1], [0, 0, 1, 1], [], []>} : vector<8x32xbf16>, vector<32x128xbf16>, vector<8x128xf32> -> vector<8x128xf32>
    %422 = arith.addf %419, %421 : vector<8x128xf32>
    %423 = vector.extract_strided_slice %422 {offsets = [0, 0], sizes = [8, 32], strides = [1, 1]} : vector<8x128xf32> to vector<8x32xf32>
    %424 = arith.negf %423 : vector<8x32xf32>
    %425 = math.exp %424 : vector<8x32xf32>
    %cst_116 = arith.constant 1.000000e+00 : f32
    %426 = vector.broadcast %cst_116 : f32 to vector<8x32xf32>
    %427 = arith.addf %426, %425 : vector<8x32xf32>
    %428 = arith.divf %426, %427 : vector<8x32xf32>
    %429 = vector.extract_strided_slice %422 {offsets = [0, 32], sizes = [8, 32], strides = [1, 1]} : vector<8x128xf32> to vector<8x32xf32>
    %430 = arith.negf %429 : vector<8x32xf32>
    %431 = math.exp %430 : vector<8x32xf32>
    %cst_117 = arith.constant 1.000000e+00 : f32
    %432 = vector.broadcast %cst_117 : f32 to vector<8x32xf32>
    %433 = arith.addf %432, %431 : vector<8x32xf32>
    %434 = arith.divf %432, %433 : vector<8x32xf32>
    %435 = vector.extract_strided_slice %422 {offsets = [0, 64], sizes = [8, 32], strides = [1, 1]} : vector<8x128xf32> to vector<8x32xf32>
    %436 = math.tanh %435 : vector<8x32xf32>
    %437 = vector.extract_strided_slice %422 {offsets = [0, 96], sizes = [8, 32], strides = [1, 1]} : vector<8x128xf32> to vector<8x32xf32>
    %438 = arith.negf %437 : vector<8x32xf32>
    %439 = math.exp %438 : vector<8x32xf32>
    %cst_118 = arith.constant 1.000000e+00 : f32
    %440 = vector.broadcast %cst_118 : f32 to vector<8x32xf32>
    %441 = arith.addf %440, %439 : vector<8x32xf32>
    %442 = arith.divf %440, %441 : vector<8x32xf32>
    %443 = arith.mulf %434, %412 : vector<8x32xf32>
    %444 = arith.mulf %428, %436 : vector<8x32xf32>
    %445 = arith.addf %443, %444 : vector<8x32xf32>
    %446 = math.tanh %445 : vector<8x32xf32>
    %447 = arith.mulf %442, %446 : vector<8x32xf32>
    %448 = arith.index_cast %417 : i32 to index
    %c0_119 = arith.constant 0 : index
    %449 = vector.load %arg7[%448, %c0_119] : memref<56x32xf32, #tpu.memory_space<vmem>>, vector<8x32xf32>
    tpu.vector_store %arg7[%448, %c0_119], %447 {strides = array<i32>} : memref<56x32xf32, #tpu.memory_space<vmem>>, vector<8x32xf32>,
    %c6_i32_120 = arith.constant 6 : i32
    %c8_i32_121 = arith.constant 8 : i32
    %450 = arith.muli %c6_i32_120, %c8_i32_121 : i32
    %451 = arith.index_cast %450 : i32 to index
    %c0_122 = arith.constant 0 : index
    %452 = vector.load %arg8[%451, %c0_122] : memref<56x128xf32, #tpu.memory_space<vmem>>, vector<8x128xf32>
    %453 = arith.truncf %447 : vector<8x32xf32> to vector<8x32xbf16>
    %cst_123 = arith.constant dense<0.000000e+00> : vector<8x128xf32>
    %454 = tpu.matmul %453, %249, %cst_123 {dimension_numbers = #tpu.dot_dimension_numbers<[1], [0], [0], [1], [0, 0, 1, 1], [], []>} : vector<8x32xbf16>, vector<32x128xbf16>, vector<8x128xf32> -> vector<8x128xf32>
    %455 = arith.addf %452, %454 : vector<8x128xf32>
    %456 = vector.extract_strided_slice %455 {offsets = [0, 0], sizes = [8, 32], strides = [1, 1]} : vector<8x128xf32> to vector<8x32xf32>
    %457 = arith.negf %456 : vector<8x32xf32>
    %458 = math.exp %457 : vector<8x32xf32>
    %cst_124 = arith.constant 1.000000e+00 : f32
    %459 = vector.broadcast %cst_124 : f32 to vector<8x32xf32>
    %460 = arith.addf %459, %458 : vector<8x32xf32>
    %461 = arith.divf %459, %460 : vector<8x32xf32>
    %462 = vector.extract_strided_slice %455 {offsets = [0, 32], sizes = [8, 32], strides = [1, 1]} : vector<8x128xf32> to vector<8x32xf32>
    %463 = arith.negf %462 : vector<8x32xf32>
    %464 = math.exp %463 : vector<8x32xf32>
    %cst_125 = arith.constant 1.000000e+00 : f32
    %465 = vector.broadcast %cst_125 : f32 to vector<8x32xf32>
    %466 = arith.addf %465, %464 : vector<8x32xf32>
    %467 = arith.divf %465, %466 : vector<8x32xf32>
    %468 = vector.extract_strided_slice %455 {offsets = [0, 64], sizes = [8, 32], strides = [1, 1]} : vector<8x128xf32> to vector<8x32xf32>
    %469 = math.tanh %468 : vector<8x32xf32>
    %470 = vector.extract_strided_slice %455 {offsets = [0, 96], sizes = [8, 32], strides = [1, 1]} : vector<8x128xf32> to vector<8x32xf32>
    %471 = arith.negf %470 : vector<8x32xf32>
    %472 = math.exp %471 : vector<8x32xf32>
    %cst_126 = arith.constant 1.000000e+00 : f32
    %473 = vector.broadcast %cst_126 : f32 to vector<8x32xf32>
    %474 = arith.addf %473, %472 : vector<8x32xf32>
    %475 = arith.divf %473, %474 : vector<8x32xf32>
    %476 = arith.mulf %467, %445 : vector<8x32xf32>
    %477 = arith.mulf %461, %469 : vector<8x32xf32>
    %478 = arith.addf %476, %477 : vector<8x32xf32>
    %479 = math.tanh %478 : vector<8x32xf32>
    %480 = arith.mulf %475, %479 : vector<8x32xf32>
    %481 = arith.index_cast %450 : i32 to index
    %c0_127 = arith.constant 0 : index
    %482 = vector.load %arg7[%481, %c0_127] : memref<56x32xf32, #tpu.memory_space<vmem>>, vector<8x32xf32>
    tpu.vector_store %arg7[%481, %c0_127], %480 {strides = array<i32>} : memref<56x32xf32, #tpu.memory_space<vmem>>, vector<8x32xf32>,
    %c7_i32_128 = arith.constant 7 : i32
    return
  }
}

</mosaic_0001>

<bundles_post_ra>
// kernel: tpu_custom_call.1
= control target key start
LH: loop header
LB: loop body
LE: loop exit
PB: predicated region body
PF: predicated region fallthrough
CT: control target
= control target key end

     0   :  { %12 = vsyncpa [#allocation4], 0  ;;  %s1777_s0 = inlined_call_operand.vmem [shape: bf16[56,32], index: 0, kind: input, shape index: {}]   ;;  %s1778_s1 = inlined_call_operand.vmem [shape: bf16[32,128], index: 1, kind: input, shape index: {}]   ;;  %s1779_s2 = inlined_call_operand.vmem [shape: bf16[32,128], index: 2, kind: input, shape index: {}]   ;;  %s1780_s3 = inlined_call_operand.hbm [shape: f32[1,128], index: 3, kind: input, shape index: {}]   ;;  %s1781_s4 = inlined_call_operand.hbm [shape: bf16[32,128], index: 4, kind: input, shape index: {}]   ;;  %s1782_s5 = inlined_call_operand.vmem [shape: bf16[32,128], index: 5, kind: input, shape index: {}]   ;;  %s1783_s6 = inlined_call_operand.vmem [shape: f32[1,128], index: 6, kind: input, shape index: {}]   ;;  %s1784_s7 = inlined_call_operand.vmem [shape: f32[56,32], index: 7, kind: output, shape index: {}]  }
   0x1   :  { %s25_s26 = sshll.u32 %s1780_s3, 4  ;;  %s26_s26 = int_to_ptr.hbm [resolvable:$true] %s25_s26 }
   0x2   :  { %13 = vsyncpa [#allocation6], 0  ;;  %s1412_s27 = smov [#allocation3]   ;;  %s35_s8 = sshll.u32 %s1781_s4, 4  ;;  %s36_s8 = int_to_ptr.hbm [resolvable:$true] %s35_s8 }
   0x3   :  { %s27_s28 = sshll.u32 %s1412_s27, 4  ;;  %s1413_s9 = smov [#allocation5]   ;;  %s28_s28 = int_to_ptr.vmem [resolvable:$true] %s27_s28 }
   0x4   :  { %30 = dma.hbm_to_vmem [thread:$0]  %s26_s26, 16, %s28_s28, [#allocation4]  }
   0x5   :  { %s37_s10 = sshll.u32 %s1413_s9, 4  ;;  %s1414_s11 = smov 64   ;;  %s38_s10 = int_to_ptr.vmem [resolvable:$true] %s37_s10 }
   0x6   :  { %s1415_s12 = smov 4  }
   0x7   :  { %43 = dma.hbm_to_vmem [thread:$0]  %s36_s8, 256, %s38_s10, [#allocation6], %s1414_s11, %s1414_s11, %s1415_s12  }
   0x8   :  { %1408 = dma.done.wait [#allocation4], 16  }
   0x9   :  { %1409 = vsyncadd [#allocation4], 4294967280 }
   0xa   :  { %1410 = dma.done.wait [#allocation6], 256  }
   0xb   :  { %1411 = vsyncadd [#allocation6], 4294967040  ;;  %v1233_v0 = vld [vmem:[%s1778_s1 + $0x8] sm:$0xff]  ;;  %v1232_v2 = vld [vmem:[%s1778_s1] sm:$0xff]  ;;  %vm102_vm0 = vcmask 261120   ;;  %v1416_v5 = vmov 0  }
   0xc   :  { %v1235_v1 = vld [vmem:[%s1779_s2 + $0x8] sm:$0xff]  ;;  %121 = vmatpush.bf16.msra.mxu0 %v1233_v0  ;;  %v1234_v3 = vld [vmem:[%s1779_s2] sm:$0xff]  ;;  %s1417_s1 = smov 32  }
   0xd   :  { %176 = vmatpush.bf16.msra.mxu1 %v1235_v1  ;;  %240 = vmatpush.bf16.msra.mxu2 %v1235_v1  ;;  %v1229_v4 = vld [vmem:[%s1777_s0] sm:$0xff]  ;;  %v1230_v61 = vld [vmem:[%s1777_s0 + $0x8] sm:$0xff] }
   0xe   :  { %304 = vmatpush.bf16.msra.mxu3 %v1235_v1  ;;  %v1483_v6 = vld [vmem:[#allocation3] ss:$0 sm:$0xff] }
  0x10   :  { %122 = vmatpush.bf16.msra.mxu0 %v1232_v2 }
  0x11   :  { %177 = vmatpush.bf16.msra.mxu1 %v1234_v3  ;;  %241 = vmatpush.bf16.msra.mxu2 %v1234_v3 }
  0x12   :  { %305 = vmatpush.bf16.msra.mxu3 %v1234_v3 }
  0x13   :  { %1171 = vmatmul.msk.bf16.vlgmr.msra.gmra.mxu0 %vm102_vm0, %v1229_v4 }
  0x14   :  { %178 = vmatmul.bf16.vlgmr.msra.gmra.mxu1 %v1416_v5 }
  0x15   :  { %368 = vmatpush.bf16.msrb.mxu1 %v1235_v1  ;;  %432 = vmatpush.bf16.msrb.mxu2 %v1235_v1 }
  0x16   :  { %496 = vmatpush.bf16.msrb.mxu3 %v1235_v1 }
  0x19   :  { %369 = vmatpush.bf16.msrb.mxu1 %v1234_v3  ;;  %433 = vmatpush.bf16.msrb.mxu2 %v1234_v3 }
  0x1a   :  { %497 = vmatpush.bf16.msrb.mxu3 %v1234_v3 }
  0x1d   :  { %560 = vmatpush.bf16.msra.mxu1 %v1235_v1 }
  0x21   :  { %561 = vmatpush.bf16.msra.mxu1 %v1234_v3 }
  0x23   :  { %1172 = vmatmul.msk.bf16.gmra.mxu0 %vm102_vm0, %v1230_v61 }
  0x90   :  { %v124_v7 = vpop.f32.mrf.mxu0 }
  0x91   :  { %v179_v8 = vpop.f32.mrf.mxu1  ;;  %v125_v9 = vadd.f32 %v1483_v6, %v124_v7 }
  0x93   :  { %v183_v10 = vadd.f32 %v179_v8, %v125_v9 }
  0x95   :  { %1248 = vtanh.f32 %v183_v10  ;;  %v1183_v13 = vmul.f32 -1.442695, %v183_v10 }
  0x97   :  { %1250 = vpow2.f32 %v1183_v13 }
  0x98   :  { %v126_v36 = vpop.f32.mrf.mxu0 }
  0x99   :  { %v181_v11 = vpop.f32.mrf.mxu1  ;;  %v127_v37 = vadd.f32 %v1483_v6, %v126_v36 }
  0x9b   :  { %v1249_v12 = vpop.eup %1248 }
  0x9c   :  { %206 = vrot.lane.b32.xlu0 %v1249_v12, %s1414_s11 }
  0x9d   :  { %v1251_v14 = vpop.eup %1250 }
  0x9e   :  { %v187_v15 = vadd.f32 1.0, %v1251_v14 }
  0xa0   :  { %1252 = vrcp.f32 %v187_v15  ;;  %v199_v21 = vand.u32 2147483648, %v187_v15  ;;  %vm193_vm2 = vweird.f32 %v187_v15  ;;  %v197_v22 = vand.u32 2147483647, %v187_v15  ;;  %v129_v2 = vpop.f32.mrf.mxu0 }
  0xa1   :  { %v130_v3 = vadd.f32 %v1483_v6, %v129_v2 }
  0xa2   :  { %v200_v24 = vor.u32 1.1754944e-38, %v199_v21  ;;  %vm198_vm4 = vcmp.eq.f32.partialorder %v197_v22, 8.507059e+37 }
  0xa6   :  { %v1253_v16 = vpop.eup %1252 }
  0xa7   :  { %v189_v17 = vmul.f32 %v1253_v16, %v187_v15  ;;  %vm194_vm1 = vweird.f32 %v1253_v16 }
  0xa8   :  { %vm195_vm3 = vmor %vm193_vm2, %vm194_vm1 }
  0xa9   :  { %v190_v18 = vsub.f32 1.0, %v189_v17 }
  0xab   :  { %v191_v19 = vmul.f32 %v1253_v16, %v190_v18 }
  0xad   :  { %v192_v20 = vadd.f32 %v1253_v16, %v191_v19 }
  0xaf   :  { %v196_v23 = vsel %vm195_vm3, %v1253_v16, %v192_v20 }
  0xb0   :  { %v201_v26 = vsel %vm198_vm4, %v200_v24, %v196_v23 }
  0xb1   :  { %v204_v28 = vmul.f32 0.0, %v201_v26 }
 0x10e   :  { %v207_v25 = vpop.permute.xlu0 %206 }
 0x10f   :  { %v209_v27 = vmul.f32 %v207_v25, %v201_v26 }
 0x111   :  { %211 = vrot.lane.b32.xlu0 %v209_v27, %s1417_s1 }
 0x183   :  { %v212_v29 = vpop.permute.xlu0 %211 }
 0x184   :  { %v214_v30 = vadd.f32 %v212_v29, %v204_v28 }
 0x186   :  { %1254 = vtanh.f32 %v214_v30 }
 0x18c   :  { %v1255_v31 = vpop.eup %1254 }
 0x18d   :  { %217 = vrot.lane.b32.xlu1 %v1255_v31, %s1414_s11 }
 0x1ff   :  { %v218_v32 = vpop.permute.xlu1 %217 }
 0x200   :  { %v1489_v33 = vmul.f32 %v218_v32, %v201_v26 }
 0x202   :  { %v227_v34 = vpack.c.bf16 %v1489_v33, %v1489_v33 }
 0x204   :  { %229 = vrot.lane.b32.xlu1 %v227_v34, %s1417_s1  ;;  %v131_v34 = vpop.f32.mrf.mxu0 }
 0x276   :  { %v230_v35 = vpop.permute.xlu1 %229 }
 0x277   :  { %1184 = vmatmul.msk.bf16.vlgmr.msra.gmra.mxu2 %vm102_vm0, %v230_v35  ;;  %v132_v35 = vadd.f32 %v1483_v6, %v131_v34 }
 0x2fa   :  { %v243_v38 = vpop.f32.mrf.mxu2 }
 0x2fb   :  { %v247_v39 = vadd.f32 %v243_v38, %v127_v37 }
 0x2fd   :  { %1256 = vtanh.f32 %v247_v39  ;;  %v1185_v42 = vmul.f32 -1.442695, %v247_v39 }
 0x2ff   :  { %1258 = vpow2.f32 %v1185_v42 }
 0x302   :  { %v245_v40 = vpop.f32.mrf.mxu2 }
 0x303   :  { %v1257_v41 = vpop.eup %1256 }
 0x304   :  { %270 = vrot.lane.b32.xlu2 %v1257_v41, %s1414_s11 }
 0x305   :  { %v1259_v43 = vpop.eup %1258 }
 0x306   :  { %v251_v44 = vadd.f32 1.0, %v1259_v43 }
 0x308   :  { %1260 = vrcp.f32 %v251_v44  ;;  %v263_v50 = vand.u32 2147483648, %v251_v44  ;;  %vm257_vm6 = vweird.f32 %v251_v44  ;;  %v261_v51 = vand.u32 2147483647, %v251_v44 }
 0x30a   :  { %v264_v53 = vor.u32 1.1754944e-38, %v263_v50  ;;  %vm262_vm8 = vcmp.eq.f32.partialorder %v261_v51, 8.507059e+37 }
 0x30e   :  { %v1261_v45 = vpop.eup %1260 }
 0x30f   :  { %v253_v46 = vmul.f32 %v1261_v45, %v251_v44  ;;  %vm258_vm5 = vweird.f32 %v1261_v45 }
 0x310   :  { %vm259_vm7 = vmor %vm257_vm6, %vm258_vm5 }
 0x311   :  { %v254_v47 = vsub.f32 1.0, %v253_v46 }
 0x313   :  { %v255_v48 = vmul.f32 %v1261_v45, %v254_v47 }
 0x315   :  { %v256_v49 = vadd.f32 %v1261_v45, %v255_v48 }
 0x317   :  { %v260_v52 = vsel %vm259_vm7, %v1261_v45, %v256_v49 }
 0x318   :  { %v265_v55 = vsel %vm262_vm8, %v264_v53, %v260_v52 }
 0x319   :  { %v268_v57 = vmul.f32 %v265_v55, %v214_v30 }
 0x35e   :  { %v271_v54 = vpop.permute.xlu2 %270 }
 0x35f   :  { %v273_v56 = vmul.f32 %v271_v54, %v265_v55 }
 0x361   :  { %275 = vrot.lane.b32.xlu2 %v273_v56, %s1417_s1 }
 0x3bb   :  { %v276_v58 = vpop.permute.xlu2 %275 }
 0x3bc   :  { %v278_v59 = vadd.f32 %v276_v58, %v268_v57 }
 0x3be   :  { %1262 = vtanh.f32 %v278_v59 }
 0x3c4   :  { %v1263_v60 = vpop.eup %1262 }
 0x3c5   :  { %281 = vrot.lane.b32.xlu0 %v1263_v60, %s1414_s11 }
 0x437   :  { %v282_v62 = vpop.permute.xlu0 %281 }
 0x438   :  { %v1503_v63 = vmul.f32 %v282_v62, %v265_v55 }
 0x43a   :  { %v291_v0 = vpack.c.bf16 %v1503_v63, %v1503_v63 }
 0x43c   :  { %293 = vrot.lane.b32.xlu1 %v291_v0, %s1417_s1 }
 0x4ae   :  { %v294_v1 = vpop.permute.xlu1 %293 }
 0x4af   :  { %1186 = vmatmul.msk.bf16.vlgmr.msra.gmra.mxu3 %vm102_vm0, %v294_v1 }
 0x532   :  { %v307_v4 = vpop.f32.mrf.mxu3 }
 0x533   :  { %v311_v7 = vadd.f32 %v307_v4, %v130_v3 }
 0x535   :  { %1264 = vtanh.f32 %v311_v7  ;;  %v1187_v10 = vmul.f32 -1.442695, %v311_v7 }
 0x537   :  { %1266 = vpow2.f32 %v1187_v10 }
 0x53a   :  { %v309_v8 = vpop.f32.mrf.mxu3 }
 0x53b   :  { %v1265_v9 = vpop.eup %1264 }
 0x53c   :  { %334 = vrot.lane.b32.xlu2 %v1265_v9, %s1414_s11 }
 0x53d   :  { %v1267_v11 = vpop.eup %1266 }
 0x53e   :  { %v315_v12 = vadd.f32 1.0, %v1267_v11 }
 0x540   :  { %1268 = vrcp.f32 %v315_v12  ;;  %v327_v18 = vand.u32 2147483648, %v315_v12  ;;  %vm321_vm10 = vweird.f32 %v315_v12  ;;  %v325_v19 = vand.u32 2147483647, %v315_v12 }
 0x542   :  { %v328_v21 = vor.u32 1.1754944e-38, %v327_v18  ;;  %vm326_vm12 = vcmp.eq.f32.partialorder %v325_v19, 8.507059e+37 }
 0x546   :  { %v1269_v13 = vpop.eup %1268 }
 0x547   :  { %v317_v14 = vmul.f32 %v1269_v13, %v315_v12  ;;  %vm322_vm9 = vweird.f32 %v1269_v13 }
 0x548   :  { %vm323_vm11 = vmor %vm321_vm10, %vm322_vm9 }
 0x549   :  { %v318_v15 = vsub.f32 1.0, %v317_v14 }
 0x54b   :  { %v319_v16 = vmul.f32 %v1269_v13, %v318_v15 }
 0x54d   :  { %v320_v17 = vadd.f32 %v1269_v13, %v319_v16 }
 0x54f   :  { %v324_v20 = vsel %vm323_vm11, %v1269_v13, %v320_v17 }
 0x550   :  { %v329_v23 = vsel %vm326_vm12, %v328_v21, %v324_v20 }
 0x551   :  { %v332_v25 = vmul.f32 %v329_v23, %v278_v59  ;;  %v1231_v59 = vld [vmem:[%s1777_s0 + $0x10] sm:$0xff] }
 0x552   :  { %1173 = vmatmul.msk.bf16.gmra.mxu0 %vm102_vm0, %v1231_v59 }
 0x596   :  { %v335_v22 = vpop.permute.xlu2 %334 }
 0x597   :  { %v337_v24 = vmul.f32 %v335_v22, %v329_v23 }
 0x599   :  { %339 = vrot.lane.b32.xlu0 %v337_v24, %s1417_s1 }
 0x5cf   :  { %v134_v1 = vpop.f32.mrf.mxu0 }
 0x5d0   :  { %v135_v2 = vadd.f32 %v1483_v6, %v134_v1 }
 0x60b   :  { %v340_v26 = vpop.permute.xlu0 %339 }
 0x60c   :  { %v342_v27 = vadd.f32 %v340_v26, %v332_v25 }
 0x60e   :  { %1270 = vtanh.f32 %v342_v27 }
 0x614   :  { %v1271_v28 = vpop.eup %1270 }
 0x615   :  { %345 = vrot.lane.b32.xlu1 %v1271_v28, %s1414_s11 }
 0x687   :  { %v346_v29 = vpop.permute.xlu1 %345 }
 0x688   :  { %v1513_v30 = vmul.f32 %v346_v29, %v329_v23  ;;  %v1237_v29 = vld [vmem:[#allocation5 + $0x8] sm:$0xff] }
 0x689   :  { %659 = vmatpush.bf16.msra.mxu2 %v1237_v29 }
 0x68a   :  { %v355_v31 = vpack.c.bf16 %v1513_v30, %v1513_v30 }
 0x68c   :  { %357 = vrot.lane.b32.xlu2 %v355_v31, %s1417_s1 }
 0x6e6   :  { %v358_v32 = vpop.permute.xlu2 %357 }
 0x6e7   :  { %1188 = vmatmul.msk.bf16.vlgmr.msrb.gmra.mxu1 %vm102_vm0, %v358_v32 }
 0x764   :  { %v371_v36 = vpop.f32.mrf.mxu1 }
 0x765   :  { %v375_v37 = vadd.f32 %v371_v36, %v132_v35 }
 0x767   :  { %1272 = vtanh.f32 %v375_v37  ;;  %v1189_v40 = vmul.f32 -1.442695, %v375_v37 }
 0x769   :  { %1274 = vpow2.f32 %v1189_v40 }
 0x76c   :  { %v373_v38 = vpop.f32.mrf.mxu1 }
 0x76d   :  { %v1273_v39 = vpop.eup %1272  ;;  %v1567_v38 = vld [vmem:[%s1782_s5 + $0x8] sm:$0xff] }
 0x76e   :  { %398 = vrot.lane.b32.xlu0 %v1273_v39, %s1414_s11  ;;  %711 = vmatpush.bf16.msra.mxu3 %v1567_v38  ;;  %v1573_v39 = vld [vmem:[%s1782_s5] sm:$0xff] }
 0x76f   :  { %v1275_v41 = vpop.eup %1274  ;;  %775 = vmatpush.bf16.msrb.mxu1 %v1567_v38  ;;  %903 = vmatpush.bf16.msrb.mxu0 %v1567_v38 }
 0x770   :  { %v379_v42 = vadd.f32 1.0, %v1275_v41  ;;  %v136_v41 = vpop.f32.mrf.mxu0 }
 0x772   :  { %1276 = vrcp.f32 %v379_v42  ;;  %v391_v48 = vand.u32 2147483648, %v379_v42  ;;  %vm385_vm14 = vweird.f32 %v379_v42  ;;  %v389_v49 = vand.u32 2147483647, %v379_v42  ;;  %712 = vmatpush.bf16.msra.mxu3 %v1573_v39 }
 0x773   :  { %776 = vmatpush.bf16.msrb.mxu1 %v1573_v39  ;;  %904 = vmatpush.bf16.msrb.mxu0 %v1573_v39 }
 0x774   :  { %v392_v51 = vor.u32 1.1754944e-38, %v391_v48  ;;  %vm390_vm1 = vcmp.eq.f32.partialorder %v389_v49, 8.507059e+37 }
 0x777   :  { %1095 = vmatpush.bf16.msra.mxu0 %v1567_v38 }
 0x778   :  { %v1277_v43 = vpop.eup %1276 }
 0x779   :  { %v381_v44 = vmul.f32 %v1277_v43, %v379_v42  ;;  %vm386_vm13 = vweird.f32 %v1277_v43  ;;  %v137_v42 = vadd.f32 %v1483_v6, %v136_v41 }
 0x77a   :  { %vm387_vm15 = vmor %vm385_vm14, %vm386_vm13 }
 0x77b   :  { %v382_v45 = vsub.f32 1.0, %v381_v44  ;;  %1096 = vmatpush.bf16.msra.mxu0 %v1573_v39 }
 0x77d   :  { %v383_v46 = vmul.f32 %v1277_v43, %v382_v45 }
 0x77f   :  { %v384_v47 = vadd.f32 %v1277_v43, %v383_v46 }
 0x781   :  { %v388_v50 = vsel %vm387_vm15, %v1277_v43, %v384_v47  ;;  %v1593_v47 = vld [vmem:[%s1783_s6] ss:$0 sm:$0xff] }
 0x782   :  { %v393_v53 = vsel %vm390_vm1, %v392_v51, %v388_v50 }
 0x783   :  { %v396_v55 = vmul.f32 %v393_v53, %v342_v27 }
 0x7e0   :  { %v399_v52 = vpop.permute.xlu0 %398 }
 0x7e1   :  { %v401_v54 = vmul.f32 %v399_v52, %v393_v53 }
 0x7e3   :  { %403 = vrot.lane.b32.xlu1 %v401_v54, %s1417_s1 }
 0x855   :  { %v404_v56 = vpop.permute.xlu1 %403 }
 0x856   :  { %v406_v57 = vadd.f32 %v404_v56, %v396_v55 }
 0x858   :  { %1278 = vtanh.f32 %v406_v57 }
 0x85e   :  { %v1279_v58 = vpop.eup %1278 }
 0x85f   :  { %409 = vrot.lane.b32.xlu2 %v1279_v58, %s1414_s11 }
 0x8b9   :  { %v410_v60 = vpop.permute.xlu2 %409 }
 0x8ba   :  { %v1527_v61 = vmul.f32 %v410_v60, %v393_v53 }
 0x8bc   :  { %v419_v62 = vpack.c.bf16 %v1527_v61, %v1527_v61 }
 0x8be   :  { %421 = vrot.lane.b32.xlu0 %v419_v62, %s1417_s1 }
 0x930   :  { %v422_v0 = vpop.permute.xlu0 %421 }
 0x931   :  { %1190 = vmatmul.msk.bf16.vlgmr.msrb.gmra.mxu2 %vm102_vm0, %v422_v0 }
 0x9b4   :  { %v435_v3 = vpop.f32.mrf.mxu2 }
 0x9b5   :  { %v439_v4 = vadd.f32 %v435_v3, %v135_v2 }
 0x9b7   :  { %1280 = vtanh.f32 %v439_v4  ;;  %v1191_v9 = vmul.f32 -1.442695, %v439_v4 }
 0x9b9   :  { %1282 = vpow2.f32 %v1191_v9 }
 0x9bc   :  { %v437_v7 = vpop.f32.mrf.mxu2 }
 0x9bd   :  { %v1281_v8 = vpop.eup %1280 }
 0x9be   :  { %462 = vrot.lane.b32.xlu1 %v1281_v8, %s1414_s11 }
 0x9bf   :  { %v1283_v10 = vpop.eup %1282 }
 0x9c0   :  { %v443_v11 = vadd.f32 1.0, %v1283_v10 }
 0x9c2   :  { %1284 = vrcp.f32 %v443_v11  ;;  %v455_v17 = vand.u32 2147483648, %v443_v11  ;;  %vm449_vm3 = vweird.f32 %v443_v11  ;;  %v453_v18 = vand.u32 2147483647, %v443_v11 }
 0x9c4   :  { %v456_v20 = vor.u32 1.1754944e-38, %v455_v17  ;;  %vm454_vm5 = vcmp.eq.f32.partialorder %v453_v18, 8.507059e+37 }
 0x9c8   :  { %v1285_v12 = vpop.eup %1284 }
 0x9c9   :  { %v445_v13 = vmul.f32 %v1285_v12, %v443_v11  ;;  %vm450_vm2 = vweird.f32 %v1285_v12 }
 0x9ca   :  { %vm451_vm4 = vmor %vm449_vm3, %vm450_vm2 }
 0x9cb   :  { %v446_v14 = vsub.f32 1.0, %v445_v13 }
 0x9cd   :  { %v447_v15 = vmul.f32 %v1285_v12, %v446_v14 }
 0x9cf   :  { %v448_v16 = vadd.f32 %v1285_v12, %v447_v15 }
 0x9d1   :  { %v452_v19 = vsel %vm451_vm4, %v1285_v12, %v448_v16 }
 0x9d2   :  { %v457_v22 = vsel %vm454_vm5, %v456_v20, %v452_v19 }
 0x9d3   :  { %v460_v24 = vmul.f32 %v457_v22, %v406_v57 }
 0xa30   :  { %v463_v21 = vpop.permute.xlu1 %462 }
 0xa31   :  { %v465_v23 = vmul.f32 %v463_v21, %v457_v22 }
 0xa33   :  { %467 = vrot.lane.b32.xlu2 %v465_v23, %s1417_s1 }
 0xa3b   :  { %222 = vrot.lane.b32.xlu2 %v1489_v33, %s1417_s1  ;;  %v1236_v33 = vld [vmem:[#allocation5] sm:$0xff] }
 0xa3c   :  { %660 = vmatpush.bf16.msra.mxu2 %v1236_v33 }
 0xa8d   :  { %v468_v25 = vpop.permute.xlu2 %467 }
 0xa8e   :  { %v1538_v26 = vadd.f32 %v468_v25, %v460_v24 }
 0xa90   :  { %1286 = vtanh.f32 %v1538_v26 }
 0xa95   :  { %v223_v27 = vpop.permute.xlu2 %222 }
 0xa96   :  { %v1287_v28 = vpop.eup %1286  ;;  %225 = vst.msk [vmem:[%s1784_s7] sm:$0xff] %vm102_vm0, %v223_v27 }
 0xa97   :  { %473 = vrot.lane.b32.xlu0 %v1287_v28, %s1414_s11 }
 0xa9f   :  { %286 = vrot.lane.b32.xlu0 %v1503_v63, %s1417_s1  ;;  %v610_v63 = vld [vmem:[%s1784_s7] sm:$0xff] }
 0xb09   :  { %v474_v31 = vpop.permute.xlu0 %473 }
 0xb0a   :  { %v1548_v32 = vmul.f32 %v474_v31, %v457_v22 }
 0xb0c   :  { %v483_v34 = vpack.c.bf16 %v1548_v32, %v1548_v32 }
 0xb0e   :  { %485 = vrot.lane.b32.xlu1 %v483_v34, %s1417_s1 }
 0xb11   :  { %v287_v35 = vpop.permute.xlu0 %286 }
 0xb12   :  { %289 = vst.msk [vmem:[%s1784_s7 + $0x8] sm:$0xff] %vm102_vm0, %v287_v35 }
 0xb19   :  { %v611_v36 = vld [vmem:[%s1784_s7 + $0x8] sm:$0xff] }
 0xb1a   :  { %v617_v37 = vpack.c.bf16 %v611_v36, %v610_v63 }
 0xb1c   :  { %1204 = vmatmul.msk.bf16.vlgmr.msra.gmra.mxu2 %vm102_vm0, %v617_v37 }
 0xb80   :  { %v486_v40 = vpop.permute.xlu1 %485 }
 0xb81   :  { %1192 = vmatmul.msk.bf16.vlgmr.msrb.gmra.mxu3 %vm102_vm0, %v486_v40  ;;  %v63_v40 = vld [vmem:[%s1777_s0 + $0x18] sm:$0xf] }
 0xb82   :  { %839 = vmatpush.bf16.msrb.mxu3 %v1567_v38  ;;  %v85_v41 = vunpack.c.l.b16 %v63_v40 }
 0xb86   :  { %840 = vmatpush.bf16.msrb.mxu3 %v1573_v39 }
 0xb91   :  { %713 = vmatmul.bf16.vlgmr.msra.gmra.mxu3 %v1416_v5 }
 0xb92   :  { %1031 = vmatpush.bf16.msra.mxu3 %v1567_v38 }
 0xb96   :  { %1032 = vmatpush.bf16.msra.mxu3 %v1573_v39 }
 0xb9f   :  { %v662_v5 = vpop.f32.mrf.mxu2 }
 0xba0   :  { %v663_v48 = vadd.f32 %v1593_v47, %v662_v5 }
 0xc04   :  { %v499_v43 = vpop.f32.mrf.mxu3 }
 0xc05   :  { %v503_v44 = vadd.f32 %v499_v43, %v137_v42  ;;  %v89_v42 = vpack.c.b16 %v85_v41, %v85_v41 }
 0xc07   :  { %1288 = vtanh.f32 %v503_v44  ;;  %v1193_v54 = vmul.f32 -1.442695, %v503_v44  ;;  %1174 = vmatmul.msk.bf16.gmra.mxu0 %vm102_vm0, %v89_v42 }
 0xc0c   :  { %v501_v45 = vpop.f32.mrf.mxu3 }
 0xc0d   :  { %v1289_v46 = vpop.eup %1288 }
 0xc0e   :  { %526 = vrot.lane.b32.xlu1 %v1289_v46, %s1414_s11 }
 0xc14   :  { %v714_v49 = vpop.f32.mrf.mxu3 }
 0xc15   :  { %v718_v50 = vadd.f32 %v714_v49, %v663_v48 }
 0xc17   :  { %1290 = vtanh.f32 %v718_v50  ;;  %v1216_v53 = vmul.f32 -1.442695, %v718_v50 }
 0xc19   :  { %1292 = vpow2.f32 %v1216_v53 }
 0xc1a   :  { %1294 = vpow2.f32 %v1193_v54 }
 0xc1c   :  { %v716_v51 = vpop.f32.mrf.mxu3 }
 0xc1d   :  { %v1291_v52 = vpop.eup %1290  ;;  %v664_v51 = vpop.f32.mrf.mxu2 }
 0xc1e   :  { %741 = vrot.lane.b32.xlu2 %v1291_v52, %s1414_s11  ;;  %v665_v52 = vadd.f32 %v1593_v47, %v664_v51 }
 0xc1f   :  { %v1293_v55 = vpop.eup %1292 }
 0xc20   :  { %v722_v56 = vadd.f32 1.0, %v1293_v55  ;;  %v1295_v57 = vpop.eup %1294 }
 0xc21   :  { %v507_v58 = vadd.f32 1.0, %v1295_v57 }
 0xc22   :  { %1296 = vrcp.f32 %v722_v56  ;;  %v734_v7 = vand.u32 2147483648, %v722_v56  ;;  %vm728_vm7 = vweird.f32 %v722_v56  ;;  %v732_v8 = vand.u32 2147483647, %v722_v56 }
 0xc23   :  { %1298 = vrcp.f32 %v507_v58  ;;  %v519_v16 = vand.u32 2147483648, %v507_v58  ;;  %vm513_vm11 = vweird.f32 %v507_v58  ;;  %v517_v17 = vand.u32 2147483647, %v507_v58 }
 0xc24   :  { %v735_v11 = vor.u32 1.1754944e-38, %v734_v7  ;;  %vm733_vm9 = vcmp.eq.f32.partialorder %v732_v8, 8.507059e+37 }
 0xc25   :  { %v520_v19 = vor.u32 1.1754944e-38, %v519_v16  ;;  %vm518_vm13 = vcmp.eq.f32.partialorder %v517_v17, 8.507059e+37 }
 0xc28   :  { %v1297_v59 = vpop.eup %1296 }
 0xc29   :  { %v724_v60 = vmul.f32 %v1297_v59, %v722_v56  ;;  %v1299_v0 = vpop.eup %1298  ;;  %vm729_vm6 = vweird.f32 %v1297_v59 }
 0xc2a   :  { %v509_v2 = vmul.f32 %v1299_v0, %v507_v58  ;;  %vm730_vm8 = vmor %vm728_vm7, %vm729_vm6  ;;  %vm514_vm10 = vweird.f32 %v1299_v0 }
 0xc2b   :  { %v725_v62 = vsub.f32 1.0, %v724_v60  ;;  %vm515_vm12 = vmor %vm513_vm11, %vm514_vm10 }
 0xc2c   :  { %v510_v4 = vsub.f32 1.0, %v509_v2 }
 0xc2d   :  { %v726_v1 = vmul.f32 %v1297_v59, %v725_v62 }
 0xc2e   :  { %v511_v10 = vmul.f32 %v1299_v0, %v510_v4 }
 0xc2f   :  { %v727_v3 = vadd.f32 %v1297_v59, %v726_v1 }
 0xc30   :  { %v512_v15 = vadd.f32 %v1299_v0, %v511_v10 }
 0xc31   :  { %v731_v9 = vsel %vm730_vm8, %v1297_v59, %v727_v3 }
 0xc32   :  { %v736_v13 = vsel %vm733_vm9, %v735_v11, %v731_v9  ;;  %v516_v18 = vsel %vm515_vm12, %v1299_v0, %v512_v15 }
 0xc33   :  { %v521_v21 = vsel %vm518_vm13, %v520_v19, %v516_v18  ;;  %v739_v23 = vmul.f32 0.0, %v736_v13 }
 0xc34   :  { %v524_v27 = vmul.f32 %v521_v21, %v1538_v26 }
 0xc78   :  { %v742_v12 = vpop.permute.xlu2 %741 }
 0xc79   :  { %v744_v14 = vmul.f32 %v742_v12, %v736_v13 }
 0xc7b   :  { %746 = vrot.lane.b32.xlu1 %v744_v14, %s1417_s1 }
 0xc80   :  { %v527_v20 = vpop.permute.xlu1 %526 }
 0xc81   :  { %v529_v22 = vmul.f32 %v527_v20, %v521_v21 }
 0xc83   :  { %531 = vrot.lane.b32.xlu0 %v529_v22, %s1417_s1 }
 0xc84   :  { %v139_v45 = vpop.f32.mrf.mxu0 }
 0xc85   :  { %v140_v5 = vadd.f32 %v1483_v6, %v139_v45 }
 0xc8c   :  { %v141_v46 = vpop.f32.mrf.mxu0 }
 0xced   :  { %v747_v24 = vpop.permute.xlu1 %746 }
 0xcee   :  { %v1599_v25 = vadd.f32 %v747_v24, %v739_v23 }
 0xcf0   :  { %1300 = vtanh.f32 %v1599_v25 }
 0xcf5   :  { %v532_v28 = vpop.permute.xlu0 %531 }
 0xcf6   :  { %v1301_v29 = vpop.eup %1300  ;;  %v1603_v33 = vadd.f32 %v532_v28, %v524_v27 }
 0xcf7   :  { %752 = vrot.lane.b32.xlu0 %v1301_v29, %s1414_s11 }
 0xcf8   :  { %1302 = vtanh.f32 %v1603_v33 }
 0xcfe   :  { %v1303_v31 = vpop.eup %1302 }
 0xcff   :  { %537 = vrot.lane.b32.xlu2 %v1303_v31, %s1414_s11 }
 0xd59   :  { %v538_v34 = vpop.permute.xlu2 %537 }
 0xd5a   :  { %v1608_v35 = vmul.f32 %v538_v34, %v521_v21 }
 0xd5c   :  { %v547_v63 = vpack.c.bf16 %v1608_v35, %v1608_v35 }
 0xd5e   :  { %549 = vrot.lane.b32.xlu1 %v547_v63, %s1417_s1 }
 0xd69   :  { %v753_v26 = vpop.permute.xlu0 %752 }
 0xd6a   :  { %v1613_v36 = vmul.f32 %v753_v26, %v736_v13 }
 0xd6c   :  { %v762_v37 = vpack.c.bf16 %v1613_v36, %v1613_v36 }
 0xd6e   :  { %764 = vrot.lane.b32.xlu2 %v762_v37, %s1417_s1 }
 0xdc8   :  { %v765_v44 = vpop.permute.xlu2 %764 }
 0xdd0   :  { %v550_v43 = vpop.permute.xlu1 %549 }
 0xdd1   :  { %1194 = vmatmul.msk.bf16.vlgmr.msra.gmra.mxu1 %vm102_vm0, %v550_v43 }
 0xdd2   :  { %967 = vmatpush.bf16.msra.mxu1 %v1567_v38 }
 0xdd6   :  { %968 = vmatpush.bf16.msra.mxu1 %v1573_v39 }
 0xde1   :  { %1217 = vmatmul.msk.bf16.vlgmr.msrb.gmra.mxu1 %vm102_vm0, %v765_v44 }
 0xe4e   :  { %v563_v48 = vpop.f32.mrf.mxu1 }
 0xe4f   :  { %v1627_v49 = vadd.f32 %v563_v48, %v140_v5 }
 0xe56   :  { %v565_v50 = vpop.f32.mrf.mxu1 }
 0xe5e   :  { %v778_v53 = vpop.f32.mrf.mxu1 }
 0xe5f   :  { %v782_v54 = vadd.f32 %v778_v53, %v665_v52 }
 0xe61   :  { %1304 = vtanh.f32 %v782_v54  ;;  %v1218_v39 = vmul.f32 -1.442695, %v782_v54 }
 0xe63   :  { %1306 = vpow2.f32 %v1218_v39 }
 0xe66   :  { %v780_v38 = vpop.f32.mrf.mxu1 }
 0xe67   :  { %v1305_v55 = vpop.eup %1304 }
 0xe68   :  { %805 = vrot.lane.b32.xlu0 %v1305_v55, %s1414_s11 }
 0xe69   :  { %v1307_v6 = vpop.eup %1306 }
 0xe6a   :  { %v786_v56 = vadd.f32 1.0, %v1307_v6 }
 0xe6c   :  { %1308 = vrcp.f32 %v786_v56  ;;  %v798_v0 = vand.u32 2147483648, %v786_v56  ;;  %vm792_vm15 = vweird.f32 %v786_v56  ;;  %v796_v1 = vand.u32 2147483647, %v786_v56 }
 0xe6e   :  { %v799_v3 = vor.u32 1.1754944e-38, %v798_v0  ;;  %vm797_vm2 = vcmp.eq.f32.partialorder %v796_v1, 8.507059e+37 }
 0xe70   :  { %350 = vrot.lane.b32.xlu0 %v1513_v30, %s1417_s1 }
 0xe72   :  { %v1309_v57 = vpop.eup %1308 }
 0xe73   :  { %v788_v58 = vmul.f32 %v1309_v57, %v786_v56  ;;  %vm793_vm14 = vweird.f32 %v1309_v57 }
 0xe74   :  { %vm794_vm1 = vmor %vm792_vm15, %vm793_vm14 }
 0xe75   :  { %v789_v59 = vsub.f32 1.0, %v788_v58 }
 0xe77   :  { %v790_v60 = vmul.f32 %v1309_v57, %v789_v59 }
 0xe79   :  { %v791_v62 = vadd.f32 %v1309_v57, %v790_v60 }
 0xe7b   :  { %v795_v2 = vsel %vm794_vm1, %v1309_v57, %v791_v62 }
 0xe7c   :  { %v800_v30 = vsel %vm797_vm2, %v799_v3, %v795_v2 }
 0xe7d   :  { %v803_v9 = vmul.f32 %v800_v30, %v1599_v25 }
 0xeda   :  { %v806_v4 = vpop.permute.xlu0 %805 }
 0xedb   :  { %v808_v7 = vmul.f32 %v806_v4, %v800_v30 }
 0xedd   :  { %810 = vrot.lane.b32.xlu1 %v808_v7, %s1417_s1 }
 0xee2   :  { %v351_v8 = vpop.permute.xlu0 %350 }
 0xee3   :  { %353 = vst.msk [vmem:[%s1784_s7 + $0x10] sm:$0xff] %vm102_vm0, %v351_v8 }
 0xee5   :  { %414 = vrot.lane.b32.xlu1 %v1527_v61, %s1417_s1 }
 0xeea   :  { %v612_v14 = vld [vmem:[%s1784_s7 + $0x10] sm:$0xff] }
 0xf4f   :  { %v811_v10 = vpop.permute.xlu1 %810 }
 0xf50   :  { %v813_v11 = vadd.f32 %v811_v10, %v803_v9 }
 0xf52   :  { %1310 = vtanh.f32 %v813_v11 }
 0xf57   :  { %v415_v12 = vpop.permute.xlu1 %414 }
 0xf58   :  { %v1311_v13 = vpop.eup %1310  ;;  %417 = vst.msk [vmem:[%s1784_s7 + $0x18] sm:$0xff] %vm102_vm0, %v415_v12 }
 0xf59   :  { %816 = vrot.lane.b32.xlu2 %v1311_v13, %s1414_s11 }
 0xf5f   :  { %v613_v61 = vld [vmem:[%s1784_s7 + $0x18] sm:$0xff] }
 0xf60   :  { %v618_v15 = vpack.c.bf16 %v613_v61, %v612_v14 }
 0xf62   :  { %1205 = vmatmul.msk.bf16.gmra.mxu2 %vm102_vm0, %v618_v15 }
 0xfb3   :  { %v817_v16 = vpop.permute.xlu2 %816 }
 0xfb4   :  { %v1653_v17 = vmul.f32 %v817_v16, %v800_v30 }
 0xfb6   :  { %v826_v18 = vpack.c.bf16 %v1653_v17, %v1653_v17 }
 0xfb8   :  { %828 = vrot.lane.b32.xlu2 %v826_v18, %s1417_s1 }
 0xfe5   :  { %v667_v20 = vpop.f32.mrf.mxu2 }
 0xfe6   :  { %v668_v21 = vadd.f32 %v1593_v47, %v667_v20 }
 0xfed   :  { %v669_v55 = vpop.f32.mrf.mxu2 }
 0xfee   :  { %v670_v39 = vadd.f32 %v1593_v47, %v669_v55 }
0x1012   :  { %v829_v19 = vpop.permute.xlu2 %828 }
0x1013   :  { %1219 = vmatmul.msk.bf16.vlgmr.msrb.gmra.mxu3 %vm102_vm0, %v829_v19 }
0x1096   :  { %v842_v22 = vpop.f32.mrf.mxu3 }
0x1097   :  { %v846_v23 = vadd.f32 %v842_v22, %v668_v21 }
0x1099   :  { %1312 = vtanh.f32 %v846_v23  ;;  %v1220_v27 = vmul.f32 -1.442695, %v846_v23 }
0x109b   :  { %1314 = vpow2.f32 %v1220_v27 }
0x109e   :  { %v844_v24 = vpop.f32.mrf.mxu3 }
0x109f   :  { %v1313_v25 = vpop.eup %1312 }
0x10a0   :  { %869 = vrot.lane.b32.xlu0 %v1313_v25, %s1414_s11 }
0x10a1   :  { %v1315_v28 = vpop.eup %1314 }
0x10a2   :  { %v850_v29 = vadd.f32 1.0, %v1315_v28 }
0x10a4   :  { %1316 = vrcp.f32 %v850_v29  ;;  %v862_v40 = vand.u32 2147483648, %v850_v29  ;;  %vm856_vm4 = vweird.f32 %v850_v29  ;;  %v860_v41 = vand.u32 2147483647, %v850_v29 }
0x10a6   :  { %v863_v43 = vor.u32 1.1754944e-38, %v862_v40  ;;  %vm861_vm6 = vcmp.eq.f32.partialorder %v860_v41, 8.507059e+37 }
0x10aa   :  { %v1317_v31 = vpop.eup %1316 }
0x10ab   :  { %v852_v34 = vmul.f32 %v1317_v31, %v850_v29  ;;  %vm857_vm3 = vweird.f32 %v1317_v31 }
0x10ac   :  { %vm858_vm5 = vmor %vm856_vm4, %vm857_vm3 }
0x10ad   :  { %v853_v63 = vsub.f32 1.0, %v852_v34 }
0x10af   :  { %v854_v26 = vmul.f32 %v1317_v31, %v853_v63 }
0x10b1   :  { %v855_v37 = vadd.f32 %v1317_v31, %v854_v26 }
0x10b3   :  { %v859_v42 = vsel %vm858_vm5, %v1317_v31, %v855_v37 }
0x10b4   :  { %v864_v45 = vsel %vm861_vm6, %v863_v43, %v859_v42 }
0x10b5   :  { %v867_v5 = vmul.f32 %v864_v45, %v813_v11 }
0x1112   :  { %v870_v44 = vpop.permute.xlu0 %869 }
0x1113   :  { %v872_v46 = vmul.f32 %v870_v44, %v864_v45 }
0x1115   :  { %874 = vrot.lane.b32.xlu1 %v872_v46, %s1417_s1 }
0x1187   :  { %v875_v48 = vpop.permute.xlu1 %874 }
0x1188   :  { %v877_v50 = vadd.f32 %v875_v48, %v867_v5 }
0x118a   :  { %1318 = vtanh.f32 %v877_v50 }
0x1190   :  { %v1319_v51 = vpop.eup %1318 }
0x1191   :  { %880 = vrot.lane.b32.xlu2 %v1319_v51, %s1414_s11 }
0x11eb   :  { %v881_v52 = vpop.permute.xlu2 %880 }
0x11ec   :  { %v1663_v53 = vmul.f32 %v881_v52, %v864_v45 }
0x11ee   :  { %v890_v54 = vpack.c.bf16 %v1663_v53, %v1663_v53 }
0x11f0   :  { %892 = vrot.lane.b32.xlu0 %v890_v54, %s1417_s1 }
0x1262   :  { %v893_v38 = vpop.permute.xlu0 %892 }
0x1263   :  { %1221 = vmatmul.msk.bf16.vlgmr.msrb.gmra.mxu0 %vm102_vm0, %v893_v38 }
0x12e0   :  { %v906_v6 = vpop.f32.mrf.mxu0 }
0x12e1   :  { %v910_v56 = vadd.f32 %v906_v6, %v670_v39  ;;  %v1195_v6 = vmul.f32 -1.442695, %v1627_v49 }
0x12e3   :  { %1320 = vtanh.f32 %v910_v56  ;;  %v1222_v59 = vmul.f32 -1.442695, %v910_v56 }
0x12e5   :  { %1322 = vpow2.f32 %v1222_v59 }
0x12e8   :  { %v908_v57 = vpop.f32.mrf.mxu0 }
0x12e9   :  { %v1321_v58 = vpop.eup %1320 }
0x12ea   :  { %933 = vrot.lane.b32.xlu1 %v1321_v58, %s1414_s11 }
0x12eb   :  { %v1323_v60 = vpop.eup %1322 }
0x12ec   :  { %v914_v62 = vadd.f32 1.0, %v1323_v60 }
0x12ee   :  { %1324 = vrcp.f32 %v914_v62  ;;  %v926_v30 = vand.u32 2147483648, %v914_v62  ;;  %vm920_vm8 = vweird.f32 %v914_v62  ;;  %v924_v7 = vand.u32 2147483647, %v914_v62 }
0x12f0   :  { %v927_v9 = vor.u32 1.1754944e-38, %v926_v30  ;;  %vm925_vm10 = vcmp.eq.f32.partialorder %v924_v7, 8.507059e+37 }
0x12f2   :  { %478 = vrot.lane.b32.xlu1 %v1548_v32, %s1417_s1 }
0x12f4   :  { %v1325_v0 = vpop.eup %1324 }
0x12f5   :  { %v916_v1 = vmul.f32 %v1325_v0, %v914_v62  ;;  %vm921_vm7 = vweird.f32 %v1325_v0 }
0x12f6   :  { %vm922_vm9 = vmor %vm920_vm8, %vm921_vm7 }
0x12f7   :  { %v917_v2 = vsub.f32 1.0, %v916_v1 }
0x12f9   :  { %v918_v3 = vmul.f32 %v1325_v0, %v917_v2 }
0x12fb   :  { %v919_v4 = vadd.f32 %v1325_v0, %v918_v3 }
0x12fd   :  { %v923_v8 = vsel %vm922_vm9, %v1325_v0, %v919_v4 }
0x12fe   :  { %v928_v32 = vsel %vm925_vm10, %v927_v9, %v923_v8 }
0x12ff   :  { %v931_v13 = vmul.f32 %v928_v32, %v877_v50 }
0x135c   :  { %v934_v10 = vpop.permute.xlu1 %933 }
0x135d   :  { %v936_v11 = vmul.f32 %v934_v10, %v928_v32 }
0x135f   :  { %938 = vrot.lane.b32.xlu2 %v936_v11, %s1417_s1 }
0x1364   :  { %v479_v12 = vpop.permute.xlu1 %478 }
0x1365   :  { %481 = vst.msk [vmem:[%s1784_s7 + $0x20] sm:$0xff] %vm102_vm0, %v479_v12 }
0x1367   :  { %542 = vrot.lane.b32.xlu2 %v1608_v35, %s1417_s1 }
0x136c   :  { %v614_v18 = vld [vmem:[%s1784_s7 + $0x20] sm:$0xff] }
0x13b9   :  { %v939_v14 = vpop.permute.xlu2 %938 }
0x13ba   :  { %v941_v61 = vadd.f32 %v939_v14, %v931_v13 }
0x13bc   :  { %1326 = vtanh.f32 %v941_v61 }
0x13c1   :  { %v543_v15 = vpop.permute.xlu2 %542 }
0x13c2   :  { %v1327_v16 = vpop.eup %1326  ;;  %545 = vst.msk [vmem:[%s1784_s7 + $0x28] sm:$0xff] %vm102_vm0, %v543_v15 }
0x13c3   :  { %944 = vrot.lane.b32.xlu0 %v1327_v16, %s1414_s11 }
0x13c9   :  { %v615_v35 = vld [vmem:[%s1784_s7 + $0x28] sm:$0xff] }
0x13ca   :  { %v619_v19 = vpack.c.bf16 %v615_v35, %v614_v18 }
0x13cc   :  { %1206 = vmatmul.msk.bf16.gmra.mxu2 %vm102_vm0, %v619_v19 }
0x1435   :  { %v945_v20 = vpop.permute.xlu0 %944 }
0x1436   :  { %v1692_v21 = vmul.f32 %v945_v20, %v928_v32 }
0x1438   :  { %v954_v22 = vpack.c.bf16 %v1692_v21, %v1692_v21 }
0x143a   :  { %956 = vrot.lane.b32.xlu0 %v954_v22, %s1417_s1 }
0x144f   :  { %v672_v24 = vpop.f32.mrf.mxu2 }
0x1450   :  { %v673_v25 = vadd.f32 %v1593_v47, %v672_v24 }
0x1457   :  { %v674_v11 = vpop.f32.mrf.mxu2 }
0x1458   :  { %v675_v12 = vadd.f32 %v1593_v47, %v674_v11 }
0x14ac   :  { %v957_v23 = vpop.permute.xlu0 %956 }
0x14ad   :  { %1223 = vmatmul.msk.bf16.vlgmr.msra.gmra.mxu1 %vm102_vm0, %v957_v23 }
0x152a   :  { %v970_v27 = vpop.f32.mrf.mxu1 }
0x152b   :  { %v974_v28 = vadd.f32 %v970_v27, %v673_v25 }
0x152d   :  { %1328 = vtanh.f32 %v974_v28  ;;  %v1224_v34 = vmul.f32 -1.442695, %v974_v28 }
0x152f   :  { %1330 = vpow2.f32 %v1224_v34 }
0x1532   :  { %v972_v29 = vpop.f32.mrf.mxu1 }
0x1533   :  { %v1329_v31 = vpop.eup %1328 }
0x1534   :  { %997 = vrot.lane.b32.xlu1 %v1329_v31, %s1414_s11 }
0x1535   :  { %v1331_v63 = vpop.eup %1330 }
0x1536   :  { %v978_v26 = vadd.f32 1.0, %v1331_v63 }
0x1538   :  { %1332 = vrcp.f32 %v978_v26  ;;  %v990_v44 = vand.u32 2147483648, %v978_v26  ;;  %vm984_vm12 = vweird.f32 %v978_v26  ;;  %v988_v45 = vand.u32 2147483647, %v978_v26 }
0x1539   :  { %1334 = vtanh.f32 %v1627_v49 }
0x153a   :  { %v991_v5 = vor.u32 1.1754944e-38, %v990_v44  ;;  %vm989_vm14 = vcmp.eq.f32.partialorder %v988_v45, 8.507059e+37 }
0x153e   :  { %v1333_v37 = vpop.eup %1332 }
0x153f   :  { %v980_v40 = vmul.f32 %v1333_v37, %v978_v26  ;;  %vm985_vm11 = vweird.f32 %v1333_v37  ;;  %v1335_v52 = vpop.eup %1334 }
0x1540   :  { %vm986_vm13 = vmor %vm984_vm12, %vm985_vm11 }
0x1541   :  { %v981_v41 = vsub.f32 1.0, %v980_v40 }
0x1543   :  { %v982_v42 = vmul.f32 %v1333_v37, %v981_v41 }
0x1545   :  { %v983_v43 = vadd.f32 %v1333_v37, %v982_v42 }
0x1547   :  { %v987_v46 = vsel %vm986_vm13, %v1333_v37, %v983_v43 }
0x1548   :  { %v992_v50 = vsel %vm989_vm14, %v991_v5, %v987_v46 }
0x1549   :  { %v995_v54 = vmul.f32 %v992_v50, %v941_v61 }
0x15a6   :  { %v998_v48 = vpop.permute.xlu1 %997 }
0x15a7   :  { %v1000_v51 = vmul.f32 %v998_v48, %v992_v50 }
0x15a9   :  { %1002 = vrot.lane.b32.xlu2 %v1000_v51, %s1417_s1 }
0x15b1   :  { %590 = vrot.lane.b32.xlu2 %v1335_v52, %s1414_s11 }
0x1603   :  { %v1003_v38 = vpop.permute.xlu2 %1002 }
0x1604   :  { %v1703_v55 = vadd.f32 %v1003_v38, %v995_v54 }
0x1606   :  { %1336 = vtanh.f32 %v1703_v55 }
0x1607   :  { %1338 = vpow2.f32 %v1195_v6 }
0x160b   :  { %v591_v8 = vpop.permute.xlu2 %590 }
0x160c   :  { %v1337_v39 = vpop.eup %1336 }
0x160d   :  { %1008 = vrot.lane.b32.xlu0 %v1337_v39, %s1414_s11  ;;  %v1339_v56 = vpop.eup %1338 }
0x160e   :  { %v571_v57 = vadd.f32 1.0, %v1339_v56 }
0x1610   :  { %1340 = vrcp.f32 %v571_v57  ;;  %v583_v4 = vand.u32 2147483648, %v571_v57  ;;  %vm577_vm1 = vweird.f32 %v571_v57  ;;  %v581_v30 = vand.u32 2147483647, %v571_v57 }
0x1612   :  { %v584_v7 = vor.u32 1.1754944e-38, %v583_v4  ;;  %vm582_vm3 = vcmp.eq.f32.partialorder %v581_v30, 8.507059e+37 }
0x1616   :  { %v1341_v58 = vpop.eup %1340 }
0x1617   :  { %v573_v59 = vmul.f32 %v1341_v58, %v571_v57  ;;  %vm578_vm15 = vweird.f32 %v1341_v58 }
0x1618   :  { %vm579_vm2 = vmor %vm577_vm1, %vm578_vm15 }
0x1619   :  { %v574_v60 = vsub.f32 1.0, %v573_v59 }
0x161b   :  { %v575_v62 = vmul.f32 %v1341_v58, %v574_v60 }
0x161d   :  { %v576_v2 = vadd.f32 %v1341_v58, %v575_v62 }
0x161f   :  { %v580_v49 = vsel %vm579_vm2, %v1341_v58, %v576_v2 }
0x1620   :  { %v585_v9 = vsel %vm582_vm3, %v584_v7, %v580_v49 }
0x1621   :  { %v593_v10 = vmul.f32 %v591_v8, %v585_v9  ;;  %v588_v15 = vmul.f32 %v585_v9, %v1603_v33 }
0x167f   :  { %v1009_v0 = vpop.permute.xlu0 %1008 }
0x1680   :  { %v1708_v1 = vmul.f32 %v1009_v0, %v992_v50 }
0x1682   :  { %v1018_v3 = vpack.c.bf16 %v1708_v1, %v1708_v1 }
0x1684   :  { %1020 = vrot.lane.b32.xlu1 %v1018_v3, %s1417_s1 }
0x168c   :  { %595 = vrot.lane.b32.xlu1 %v593_v10, %s1417_s1 }
0x16f6   :  { %v1021_v32 = vpop.permute.xlu1 %1020 }
0x16f7   :  { %1225 = vmatmul.msk.bf16.vlgmr.msra.gmra.mxu3 %vm102_vm0, %v1021_v32 }
0x16fe   :  { %v596_v61 = vpop.permute.xlu1 %595 }
0x16ff   :  { %v598_v16 = vadd.f32 %v596_v61, %v588_v15 }
0x177a   :  { %v1034_v13 = vpop.f32.mrf.mxu3 }
0x177b   :  { %v1038_v14 = vadd.f32 %v1034_v13, %v675_v12 }
0x177d   :  { %1342 = vtanh.f32 %v1038_v14  ;;  %v1226_v20 = vmul.f32 -1.442695, %v1038_v14 }
0x177e   :  { %1344 = vtanh.f32 %v598_v16 }
0x177f   :  { %1346 = vpow2.f32 %v1226_v20 }
0x1782   :  { %v1036_v18 = vpop.f32.mrf.mxu3 }
0x1783   :  { %v1343_v35 = vpop.eup %1342 }
0x1784   :  { %1061 = vrot.lane.b32.xlu0 %v1343_v35, %s1414_s11  ;;  %v1345_v19 = vpop.eup %1344 }
0x1785   :  { %v1347_v22 = vpop.eup %1346 }
0x1786   :  { %v1042_v23 = vadd.f32 1.0, %v1347_v22 }
0x1788   :  { %1348 = vrcp.f32 %v1042_v23  ;;  %v1054_v33 = vand.u32 2147483648, %v1042_v23  ;;  %vm1048_vm5 = vweird.f32 %v1042_v23  ;;  %v1052_v31 = vand.u32 2147483647, %v1042_v23 }
0x178a   :  { %v1055_v63 = vor.u32 1.1754944e-38, %v1054_v33  ;;  %vm1053_vm7 = vcmp.eq.f32.partialorder %v1052_v31, 8.507059e+37 }
0x178c   :  { %601 = vrot.lane.b32.xlu0 %v1345_v19, %s1414_s11 }
0x178e   :  { %v1349_v24 = vpop.eup %1348 }
0x178f   :  { %v1044_v25 = vmul.f32 %v1349_v24, %v1042_v23  ;;  %vm1049_vm4 = vweird.f32 %v1349_v24 }
0x1790   :  { %vm1050_vm6 = vmor %vm1048_vm5, %vm1049_vm4 }
0x1791   :  { %v1045_v27 = vsub.f32 1.0, %v1044_v25 }
0x1793   :  { %v1046_v28 = vmul.f32 %v1349_v24, %v1045_v27 }
0x1795   :  { %v1047_v29 = vadd.f32 %v1349_v24, %v1046_v28 }
0x1797   :  { %v1051_v34 = vsel %vm1050_vm6, %v1349_v24, %v1047_v29 }
0x1798   :  { %v1056_v37 = vsel %vm1053_vm7, %v1055_v63, %v1051_v34 }
0x1799   :  { %v1059_v43 = vmul.f32 %v1056_v37, %v1703_v55 }
0x17f6   :  { %v1062_v26 = vpop.permute.xlu0 %1061 }
0x17f7   :  { %v1064_v40 = vmul.f32 %v1062_v26, %v1056_v37 }
0x17f9   :  { %1066 = vrot.lane.b32.xlu2 %v1064_v40, %s1417_s1 }
0x17fe   :  { %v602_v41 = vpop.permute.xlu0 %601 }
0x17ff   :  { %v604_v42 = vmul.f32 %v602_v41, %v585_v9 }
0x1801   :  { %606 = vrot.lane.b32.xlu2 %v604_v42, %s1417_s1 }
0x1853   :  { %v1067_v44 = vpop.permute.xlu2 %1066 }
0x1854   :  { %v1069_v45 = vadd.f32 %v1067_v44, %v1059_v43 }
0x1856   :  { %1350 = vtanh.f32 %v1069_v45 }
0x185b   :  { %v607_v46 = vpop.permute.xlu2 %606 }
0x185c   :  { %v1351_v5 = vpop.eup %1350  ;;  %609 = vst.msk [vmem:[%s1784_s7 + $0x30] sm:$0xff] %vm102_vm0, %v607_v46 }
0x185d   :  { %1072 = vrot.lane.b32.xlu1 %v1351_v5, %s1414_s11 }
0x1863   :  { %v616_v48 = vld [vmem:[%s1784_s7 + $0x30] sm:$0xff] }
0x1864   :  { %v620_v50 = vpack.c.bf16 %v616_v48, %v616_v48 }
0x1866   :  { %1207 = vmatmul.msk.bf16.gmra.mxu2 %vm102_vm0, %v620_v50 }
0x18cf   :  { %v1073_v51 = vpop.permute.xlu1 %1072 }
0x18d0   :  { %v1075_v52 = vmul.f32 %v1073_v51, %v1056_v37 }
0x18d2   :  { %v1082_v54 = vpack.c.bf16 %v1075_v52, %v1075_v52 }
0x18d4   :  { %1084 = vrot.lane.b32.xlu0 %v1082_v54, %s1417_s1 }
0x18e9   :  { %v677_v38 = vpop.f32.mrf.mxu2 }
0x18ea   :  { %v678_v6 = vadd.f32 %v1593_v47, %v677_v38 }
0x18f1   :  { %v679_v55 = vpop.f32.mrf.mxu2 }
0x1946   :  { %v1085_v39 = vpop.permute.xlu0 %1084 }
0x1947   :  { %1227 = vmatmul.msk.bf16.vlgmr.msra.gmra.mxu0 %vm102_vm0, %v1085_v39 }
0x19c4   :  { %v1098_v56 = vpop.f32.mrf.mxu0 }
0x19c5   :  { %v1102_v57 = vadd.f32 %v1098_v56, %v678_v6 }
0x19c7   :  { %1352 = vtanh.f32 %v1102_v57  ;;  %v1228_v60 = vmul.f32 -1.442695, %v1102_v57 }
0x19c9   :  { %1354 = vpow2.f32 %v1228_v60 }
0x19cc   :  { %v1100_v58 = vpop.f32.mrf.mxu0 }
0x19cd   :  { %v1353_v59 = vpop.eup %1352 }
0x19ce   :  { %1125 = vrot.lane.b32.xlu1 %v1353_v59, %s1414_s11 }
0x19cf   :  { %v1355_v62 = vpop.eup %1354 }
0x19d0   :  { %v1106_v0 = vadd.f32 1.0, %v1355_v62 }
0x19d2   :  { %1356 = vrcp.f32 %v1106_v0  ;;  %v1118_v49 = vand.u32 2147483648, %v1106_v0  ;;  %vm1112_vm9 = vweird.f32 %v1106_v0  ;;  %v1116_v7 = vand.u32 2147483647, %v1106_v0 }
0x19d4   :  { %vm1117_vm11 = vcmp.eq.f32.partialorder %v1116_v7, 8.507059e+37 }
0x19d6   :  { %757 = vrot.lane.b32.xlu1 %v1613_v36, %s1417_s1  ;;  %v1119_v36 = vor.u32 1.1754944e-38, %v1118_v49 }
0x19d8   :  { %v1357_v2 = vpop.eup %1356 }
0x19d9   :  { %v1108_v47 = vmul.f32 %v1357_v2, %v1106_v0  ;;  %vm1113_vm8 = vweird.f32 %v1357_v2 }
0x19da   :  { %vm1114_vm10 = vmor %vm1112_vm9, %vm1113_vm8 }
0x19db   :  { %v1109_v3 = vsub.f32 1.0, %v1108_v47 }
0x19dd   :  { %v1110_v4 = vmul.f32 %v1357_v2, %v1109_v3 }
0x19de   :  { %949 = vrot.lane.b32.xlu1 %v1692_v21, %s1417_s1 }
0x19df   :  { %v1111_v30 = vadd.f32 %v1357_v2, %v1110_v4 }
0x19e1   :  { %v1115_v8 = vsel %vm1114_vm10, %v1357_v2, %v1111_v30 }
0x19e2   :  { %v1120_v21 = vsel %vm1117_vm11, %v1119_v36, %v1115_v8 }
0x19e3   :  { %v1123_v12 = vmul.f32 %v1120_v21, %v1069_v45 }
0x1a40   :  { %v1126_v9 = vpop.permute.xlu1 %1125 }
0x1a41   :  { %v1128_v10 = vmul.f32 %v1126_v9, %v1120_v21 }
0x1a43   :  { %1130 = vrot.lane.b32.xlu2 %v1128_v10, %s1417_s1 }
0x1a48   :  { %v758_v32 = vpop.permute.xlu1 %757 }
0x1a49   :  { %760 = vst.msk [vmem:[%s1784_s7] sm:$0xff] %vm102_vm0, %v758_v32 }
0x1a4b   :  { %821 = vrot.lane.b32.xlu2 %v1653_v17, %s1417_s1 }
0x1a50   :  { %v950_v11 = vpop.permute.xlu1 %949 }
0x1a51   :  { %952 = vst.msk [vmem:[%s1784_s7 + $0x18] sm:$0xff] %vm102_vm0, %v950_v11 }
0x1a53   :  { %1013 = vrot.lane.b32.xlu2 %v1708_v1, %s1417_s1 }
0x1a9d   :  { %v1131_v13 = vpop.permute.xlu2 %1130 }
0x1a9e   :  { %v1133_v14 = vadd.f32 %v1131_v13, %v1123_v12 }
0x1aa0   :  { %1358 = vtanh.f32 %v1133_v14 }
0x1aa5   :  { %v822_v61 = vpop.permute.xlu2 %821 }
0x1aa6   :  { %v1359_v15 = vpop.eup %1358  ;;  %824 = vst.msk [vmem:[%s1784_s7 + $0x8] sm:$0xff] %vm102_vm0, %v822_v61 }
0x1aa7   :  { %1136 = vrot.lane.b32.xlu0 %v1359_v15, %s1414_s11 }
0x1aad   :  { %v1014_v17 = vpop.permute.xlu2 %1013 }
0x1aae   :  { %1016 = vst.msk [vmem:[%s1784_s7 + $0x20] sm:$0xff] %vm102_vm0, %v1014_v17 }
0x1aaf   :  { %885 = vrot.lane.b32.xlu0 %v1663_v53, %s1417_s1 }
0x1ab7   :  { %1077 = vrot.lane.b32.xlu0 %v1075_v52, %s1417_s1 }
0x1b19   :  { %v1137_v1 = vpop.permute.xlu0 %1136 }
0x1b1a   :  { %v1139_v16 = vmul.f32 %v1137_v1, %v1120_v21 }
0x1b1c   :  { %1141 = vrot.lane.b32.xlu1 %v1139_v16, %s1417_s1 }
0x1b21   :  { %v886_v18 = vpop.permute.xlu0 %885 }
0x1b22   :  { %888 = vst.msk [vmem:[%s1784_s7 + $0x10] sm:$0xff] %vm102_vm0, %v886_v18 }
0x1b29   :  { %v1078_v35 = vpop.permute.xlu0 %1077 }
0x1b2a   :  { %1080 = vst.msk [vmem:[%s1784_s7 + $0x28] sm:$0xff] %vm102_vm0, %v1078_v35 }
0x1b8e   :  { %v1142_v19 = vpop.permute.xlu1 %1141 }
0x1b8f   :  { %1144 = vst.msk [vmem:[%s1784_s7 + $0x30] sm:$0xff] %vm102_vm0, %v1142_v19 }
0x1b90   :  { %1149 = vsyncpa [#allocation4], 1 }
0x1b91   :  { %1150 = vsyncpa [#allocation6], 1 }

</bundles_post_ra>
